<compile_context>
chip_gen: v7x
topology: tpu7x:2x2x1
jax: 0.10.0
libtpu: 0.0.40
codegen_flags: <defaults>
</compile_context>

<pallas_src>
import functools
import math

import jax
import jax.numpy as jnp
from jax import lax
from jax.experimental import pallas as pl
from jax.experimental.pallas import tpu as pltpu


def _round_up(x, m):
    return (x + m - 1) // m * m


# ----------------------------------------------------------------------------
# Fused decoder kernel: one grid step = (one batch element, one layer)
# ----------------------------------------------------------------------------
def _decoder_kernel(
    # per-batch activations / additive mask biases
    tok_ref, pos_ref, enc_ref, tbias_ref, sbias_ref,
    # per-layer weights (leading block dim of 1 selected by the layer grid axis)
    wq_sa_ref, bq_sa_ref, wkv_sa_ref, bkv_sa_ref, wo_sa_ref, bo_sa_ref,
    wq_e_ref, bq_e_ref, wkv_e_ref, bkv_e_ref, wo_e_ref, bo_e_ref,
    w1_ref, b1_ref, w2_ref, b2_ref,
    g1_ref, be1_ref, g2_ref, be2_ref, g3_ref, be3_ref,
    # vocab projection (resident across the whole grid)
    wout_ref, bout_ref,
    # outputs
    out_ref, attn_ref,
    # scratch: residual stream carried across the layer grid axis
    x_vmem,
    *, n_heads, emb_scale,
):
    li = pl.program_id(1)
    n_layers = pl.num_programs(1)
    H = tok_ref.shape[-1]
    Dh = H // n_heads
    cdt = jnp.bfloat16   # MXU operand dtype (accumulation stays f32)

    @pl.when(li == 0)
    def _():
        # token * sqrt(hid_dim) + positional embedding (dropout = identity, eval mode)
        x_vmem[...] = tok_ref[...] * emb_scale + pos_ref[...]

    def layernorm(z, g, b):
        mu = jnp.mean(z, axis=-1, keepdims=True)
        var = jnp.mean((z - mu) ** 2, axis=-1, keepdims=True)
        return (z - mu) * lax.rsqrt(var + 1e-5) * g + b

    def mha(x_q, src, wq_r, bq_r, wkv, bkv, wo_r, bo, bias):
        # x_q: [Lq, H] f32, src: [Lk, H] f32, bias: additive mask broadcastable to [Lq, Lk]
        Lq = x_q.shape[0]
        Lk = src.shape[0]
        # Q emitted directly in head-major [nh, Lq, Dh] layout (1/sqrt(Dh) folded into
        # the weights at prep time) -> no in-kernel lane reshapes / per-head slicing.
        xq_b = jnp.broadcast_to(x_q.astype(cdt)[None], (n_heads, Lq, H))
        q = lax.dot_general(xq_b, wq_r, (((2,), (1,)), ((0,), (0,))),
                            preferred_element_type=jnp.float32) + bq_r        # [nh,Lq,Dh]
        # Fused K/V projection; heads split along the MAJOR dim after one 2-D transpose,
        # so every reshape only touches leading dims (layout-preserving).
        kv = lax.dot_general(src.astype(cdt), wkv, (((1,), (0,)), ((), ())),
                             preferred_element_type=jnp.float32) + bkv        # [Lk, 2H]
        kvT = kv.T                                                            # [2H, Lk]
        k_dl = kvT[:H].reshape(n_heads, Dh, Lk).astype(cdt)                   # [nh,Dh,Lk]
        v_dl = kvT[H:].reshape(n_heads, Dh, Lk).astype(cdt)                   # [nh,Dh,Lk]
        # scores: one batched MXU matmul over all heads
        e = lax.dot_general(q.astype(cdt), k_dl, (((2,), (1,)), ((0,), (0,))),
                            preferred_element_type=jnp.float32)               # [nh,Lq,Lk]
        e = e + bias                            # additive mask bias (0 / -1e10), precomputed
        m = jnp.max(e, axis=-1, keepdims=True)
        p = jnp.exp(e - m)
        a = p * pl.reciprocal(jnp.sum(p, axis=-1, keepdims=True), approx=True)
        # context: batched matmul, both operands contract on their last dim
        o = lax.dot_general(a.astype(cdt), v_dl, (((2,), (2,)), ((0,), (0,))),
                            preferred_element_type=jnp.float32)               # [nh,Lq,Dh]
        # output projection with head-major weights -> sum over heads (no lane concat)
        ctx = lax.dot_general(o.astype(cdt), wo_r, (((2,), (1,)), ((0,), (0,))),
                              preferred_element_type=jnp.float32)             # [nh,Lq,H]
        return jnp.sum(ctx, axis=0) + bo, a

    x = x_vmem[...]
    enc = enc_ref[...]
    tbias = tbias_ref[0]        # [L, L]
    sbias = sbias_ref[0]        # [1, Ls_pad]

    # ---- masked self-attention + residual + LN ----
    sa, _ = mha(x, x, wq_sa_ref[0], bq_sa_ref[0], wkv_sa_ref[0], bkv_sa_ref[0],
                wo_sa_ref[0], bo_sa_ref[0], tbias)
    x = layernorm(x + sa, g1_ref[0], be1_ref[0])

    # ---- encoder attention + residual + LN ----
    ea, a_enc = mha(x, enc, wq_e_ref[0], bq_e_ref[0], wkv_e_ref[0], bkv_e_ref[0],
                    wo_e_ref[0], bo_e_ref[0], sbias)
    x = layernorm(x + ea, g2_ref[0], be2_ref[0])

    # ---- position-wise feed-forward + residual + LN ----
    h = jnp.maximum(
        lax.dot_general(x.astype(cdt), w1_ref[0], (((1,), (0,)), ((), ())),
                        preferred_element_type=jnp.float32) + b1_ref[0], 0.0)
    h = lax.dot_general(h.astype(cdt), w2_ref[0], (((1,), (0,)), ((), ())),
                        preferred_element_type=jnp.float32) + b2_ref[0]
    x = layernorm(x + h, g3_ref[0], be3_ref[0])

    x_vmem[...] = x

    # Final layer: lane-dense vocab projection + the only attention tensor the module
    # returns (last layer's encoder attention), stored in one go.
    @pl.when(li == n_layers - 1)
    def _():
        out_ref[...] = (lax.dot_general(x.astype(cdt), wout_ref[...],
                                        (((1,), (0,)), ((), ())),
                                        preferred_element_type=jnp.float32)
                        + bout_ref[...]).astype(out_ref.dtype)
        attn_ref[0] = a_enc


# ----------------------------------------------------------------------------
# Forward wrapper: embedding gather (data-dependent, XLA glue) + single pallas_call
# ----------------------------------------------------------------------------
def decoder_forward(prep, trg_ids, enc_src, trg_mask, src_mask, *,
                    n_layers, n_heads, vocab_size):
    B, L = trg_ids.shape
    Ls = enc_src.shape[1]
    H = prep["pos_emb"].shape[1]
    V_pad = prep["wout"].shape[1]
    Ls_pad = _round_up(Ls, 128)

    # TODO(synk): token/position embedding lookups are data-dependent gathers; kept as
    # XLA glue (could be fused via PrefetchScalarGridSpec + pl.Element row gather).
    tok = jnp.take(prep["tok_emb"], trg_ids.reshape(-1), axis=0)            # [B*L, H]
    pos = prep["pos_emb"][:L]                                               # [L, H]

    # Pad the encoder sequence to a lane-dense multiple of 128; padded keys are masked
    # out via the additive bias and sliced off afterwards.
    enc_p = jnp.pad(enc_src.astype(jnp.float32), ((0, 0), (0, Ls_pad - Ls), (0, 0)))
    enc2d = enc_p.reshape(B * Ls_pad, H)

    # Precompute additive mask biases once (replaces per-head/per-layer compare+select).
    tbias = jnp.where(trg_mask.reshape(B, L, L) == 0, -1e10, 0.0).astype(jnp.float32)
    smask = jnp.pad(src_mask.reshape(B, 1, Ls).astype(jnp.float32),
                    ((0, 0), (0, 0), (0, Ls_pad - Ls)))
    sbias = jnp.where(smask == 0, -1e10, 0.0).astype(jnp.float32)

    layer_wnames = ["wq_sa", "bq_sa", "wkv_sa", "bkv_sa", "wo_sa", "bo_sa",
                    "wq_e", "bq_e", "wkv_e", "bkv_e", "wo_e", "bo_e",
                    "w1", "b1", "w2", "b2",
                    "g1", "be1", "g2", "be2", "g3", "be3"]
    layer_ws = [prep[n] for n in layer_wnames]
    fixed_ws = [prep["wout"], prep["bout"]]

    def layer_spec(w):
        nd = w.ndim
        return pl.BlockSpec((1,) + w.shape[1:],
                            lambda b, l, _nd=nd: (l,) + (0,) * (_nd - 1))

    def fixed_spec(w):
        nd = w.ndim
        return pl.BlockSpec(w.shape, lambda b, l, _nd=nd: (0,) * _nd)

    in_specs = [
        pl.BlockSpec((L, H), lambda b, l: (b, 0)),             # tok (per-batch rows)
        pl.BlockSpec((L, H), lambda b, l: (0, 0)),             # pos (shared)
        pl.BlockSpec((Ls_pad, H), lambda b, l: (b, 0)),        # enc_src (per-batch rows)
        pl.BlockSpec((1, L, L), lambda b, l: (b, 0, 0)),       # self-attn mask bias
        pl.BlockSpec((1, 1, Ls_pad), lambda b, l: (b, 0, 0)),  # enc-attn mask bias
    ] + [layer_spec(w) for w in layer_ws] + [fixed_spec(w) for w in fixed_ws]

    out_specs = (
        pl.BlockSpec((L, V_pad), lambda b, l: (b, 0)),
        pl.BlockSpec((1, n_heads, L, Ls_pad), lambda b, l: (b, 0, 0, 0)),
    )
    out_shape = (
        jax.ShapeDtypeStruct((B * L, V_pad), jnp.float32),
        jax.ShapeDtypeStruct((B, n_heads, L, Ls_pad), jnp.float32),
    )

    # Size scoped VMEM to the real resident set (one layer's weights double-buffered
    # for layer streaming + per-batch activations + outputs) with headroom.
    def _nb(a):
        return int(a.size) * a.dtype.itemsize
    per_step = (2 * L * H * 4 + Ls_pad * H * 4 + L * L * 4 + Ls_pad * 4
                + sum(_nb(w) // n_layers for w in layer_ws)
                + sum(_nb(w) for w in fixed_ws)
                + L * V_pad * 4 + n_heads * L * Ls_pad * 4 + L * H * 4)
    vmem_limit = int(min(max(4 * per_step, 32 * 2 ** 20), 64 * 2 ** 20))

    kernel = functools.partial(_decoder_kernel, n_heads=n_heads,
                               emb_scale=math.sqrt(H))

    logits, attention = pl.pallas_call(
        kernel,
        grid=(B, n_layers),
        out_shape=out_shape,
        in_specs=in_specs,
        out_specs=out_specs,
        scratch_shapes=[pltpu.VMEM((L, H), jnp.float32)],
        compiler_params=pltpu.CompilerParams(
            dimension_semantics=("parallel", "arbitrary"),
            vmem_limit_bytes=vmem_limit),
    )(tok, pos, enc2d, tbias, sbias, *layer_ws, *fixed_ws)

    return (logits[:, :vocab_size].reshape(B, L, vocab_size),
            attention[..., :Ls])


# ----------------------------------------------------------------------------
# Parameter init (PyTorch nn.Linear layout) + one-time prep
# ----------------------------------------------------------------------------
def _init_linear(key, out_dim, in_dim):
    w = jax.random.normal(key, (out_dim, in_dim), jnp.float32) * 0.02
    b = jnp.zeros((out_dim,), jnp.float32)
    return {"w": w, "b": b}


def init_decoder_params(key, output_dim, hid_dim, n_layers, n_heads, pf_dim,
                        max_length=100):
    keys = jax.random.split(key, 4 + n_layers)
    params = {
        "tok_emb": jax.random.normal(keys[0], (output_dim, hid_dim), jnp.float32) * 0.02,
        "pos_emb": jax.random.normal(keys[1], (max_length, hid_dim), jnp.float32) * 0.02,
        "fc_out": _init_linear(keys[2], output_dim, hid_dim),
        "layers": [],
    }
    for li in range(n_layers):
        lk = jax.random.split(keys[4 + li], 10)
        layer = {
            "self_attn": {
                "fc_q": _init_linear(lk[0], hid_dim, hid_dim),
                "fc_k": _init_linear(lk[1], hid_dim, hid_dim),
                "fc_v": _init_linear(lk[2], hid_dim, hid_dim),
                "fc_o": _init_linear(lk[3], hid_dim, hid_dim),
            },
            "enc_attn": {
                "fc_q": _init_linear(lk[4], hid_dim, hid_dim),
                "fc_k": _init_linear(lk[5], hid_dim, hid_dim),
                "fc_v": _init_linear(lk[6], hid_dim, hid_dim),
                "fc_o": _init_linear(lk[7], hid_dim, hid_dim),
            },
            "ff": {
                "w1": jax.random.normal(lk[8], (pf_dim, hid_dim), jnp.float32) * 0.02,
                "b1": jnp.zeros((pf_dim,), jnp.float32),
                "w2": jax.random.normal(lk[9], (hid_dim, pf_dim), jnp.float32) * 0.02,
                "b2": jnp.zeros((hid_dim,), jnp.float32),
            },
            "ln1": {"g": jnp.ones((hid_dim,), jnp.float32), "b": jnp.zeros((hid_dim,), jnp.float32)},
            "ln2": {"g": jnp.ones((hid_dim,), jnp.float32), "b": jnp.zeros((hid_dim,), jnp.float32)},
            "ln3": {"g": jnp.ones((hid_dim,), jnp.float32), "b": jnp.zeros((hid_dim,), jnp.float32)},
        }
        params["layers"].append(layer)
    return params


def prepare_decoder_params(params, n_heads):
    """One-time weight prep (free at inference):
       * nn.Linear weights transposed to [in, out], MXU operands cast to bf16
       * K/V projections fused; Q projections reshaped head-major [nh, H, Dh] with
         1/sqrt(head_dim) folded in; fc_o reshaped to [nh, Dh, H]
       * per-layer params stacked along a leading n_layers axis (streamed via the
         layer grid axis); vocab projection padded to a lane-dense multiple of 128."""
    layers = params["layers"]
    H = params["tok_emb"].shape[1]
    Dh = H // n_heads
    inv = 1.0 / math.sqrt(Dh)
    V = params["fc_out"]["w"].shape[0]
    V_pad = _round_up(V, 128)
    bf16, f32 = jnp.bfloat16, jnp.float32

    def q_w(p):    # [nh, H_in, Dh], scale folded in
        return (p["w"].reshape(n_heads, Dh, H).transpose(0, 2, 1) * inv).astype(bf16)

    def q_b(p):    # [nh, 1, Dh], scale folded in
        return (p["b"].reshape(n_heads, 1, Dh) * inv).astype(f32)

    def kv_w(a):   # fused K|V: [H, 2H]
        return jnp.concatenate([a["fc_k"]["w"].T, a["fc_v"]["w"].T], axis=1).astype(bf16)

    def kv_b(a):   # [1, 2H]
        return jnp.concatenate([a["fc_k"]["b"], a["fc_v"]["b"]], axis=0)[None].astype(f32)

    def o_w(p):    # [nh, Dh, H_out]
        return p["w"].T.reshape(n_heads, Dh, H).astype(bf16)

    def stack(fn):
        return jnp.stack([fn(lp) for lp in layers], axis=0)

    return {
        "tok_emb": params["tok_emb"].astype(f32),
        "pos_emb": params["pos_emb"].astype(f32),
        "wout": jnp.pad(params["fc_out"]["w"].T, ((0, 0), (0, V_pad - V))).astype(bf16),
        "bout": jnp.pad(params["fc_out"]["b"], (0, V_pad - V))[None].astype(f32),
        # self-attention
        "wq_sa": stack(lambda lp: q_w(lp["self_attn"]["fc_q"])),
        "bq_sa": stack(lambda lp: q_b(lp["self_attn"]["fc_q"])),
        "wkv_sa": stack(lambda lp: kv_w(lp["self_attn"])),
        "bkv_sa": stack(lambda lp: kv_b(lp["self_attn"])),
        "wo_sa": stack(lambda lp: o_w(lp["self_attn"]["fc_o"])),
        "bo_sa": stack(lambda lp: lp["self_attn"]["fc_o"]["b"][None].astype(f32)),
        # encoder attention
        "wq_e": stack(lambda lp: q_w(lp["enc_attn"]["fc_q"])),
        "bq_e": stack(lambda lp: q_b(lp["enc_attn"]["fc_q"])),
        "wkv_e": stack(lambda lp: kv_w(lp["enc_attn"])),
        "bkv_e": stack(lambda lp: kv_b(lp["enc_attn"])),
        "wo_e": stack(lambda lp: o_w(lp["enc_attn"]["fc_o"])),
        "bo_e": stack(lambda lp: lp["enc_attn"]["fc_o"]["b"][None].astype(f32)),
        # feed-forward
        "w1": stack(lambda lp: lp["ff"]["w1"].T.astype(bf16)),
        "b1": stack(lambda lp: lp["ff"]["b1"][None].astype(f32)),
        "w2": stack(lambda lp: lp["ff"]["w2"].T.astype(bf16)),
        "b2": stack(lambda lp: lp["ff"]["b2"][None].astype(f32)),
        # layer norms (stay on the f32 elementwise path)
        "g1": stack(lambda lp: lp["ln1"]["g"][None].astype(f32)),
        "be1": stack(lambda lp: lp["ln1"]["b"][None].astype(f32)),
        "g2": stack(lambda lp: lp["ln2"]["g"][None].astype(f32)),
        "be2": stack(lambda lp: lp["ln2"]["b"][None].astype(f32)),
        "g3": stack(lambda lp: lp["ln3"]["g"][None].astype(f32)),
        "be3": stack(lambda lp: lp["ln3"]["b"][None].astype(f32)),
    }


# ----------------------------------------------------------------------------
# Pure-JAX reference (mirrors the PyTorch module) for a correctness check
# ----------------------------------------------------------------------------
def _reference_forward(params, trg_ids, enc_src, trg_mask, src_mask, n_heads):
    def lin(x, p):
        return x @ p["w"].T + p["b"]

    def ln(x, p):
        m = x.mean(-1, keepdims=True)
        v = ((x - m) ** 2).mean(-1, keepdims=True)
        return (x - m) / jnp.sqrt(v + 1e-5) * p["g"] + p["b"]

    def mha(p, q, k, v, mask):
        B, Lq, H = q.shape
        Lk = k.shape[1]
        Dh = H // n_heads
        Q = lin(q, p["fc_q"]).reshape(B, Lq, n_heads, Dh).transpose(0, 2, 1, 3)
        K = lin(k, p["fc_k"]).reshape(B, Lk, n_heads, Dh).transpose(0, 2, 1, 3)
        V = lin(v, p["fc_v"]).reshape(B, Lk, n_heads, Dh).transpose(0, 2, 1, 3)
        e = jnp.einsum("bhqd,bhkd->bhqk", Q, K) / math.sqrt(Dh)
        e = jnp.where(mask == 0, -1e10, e)
        a = jax.nn.softmax(e, axis=-1)
        o = jnp.einsum("bhqk,bhkd->bhqd", a, V).transpose(0, 2, 1, 3).reshape(B, Lq, H)
        return lin(o, p["fc_o"]), a

    B, L = trg_ids.shape
    H = params["tok_emb"].shape[1]
    x = params["tok_emb"][trg_ids] * math.sqrt(H) + params["pos_emb"][jnp.arange(L)][None]
    attn = None
    for lp in params["layers"]:
        sa, _ = mha(lp["self_attn"], x, x, x, trg_mask)
        x = ln(x + sa, lp["ln1"])
        ea, attn = mha(lp["enc_attn"], x, enc_src, enc_src, src_mask)
        x = ln(x + ea, lp["ln2"])
        h = jnp.maximum(x @ lp["ff"]["w1"].T + lp["ff"]["b1"], 0.0) @ lp["ff"]["w2"].T + lp["ff"]["b2"]
        x = ln(x + h, lp["ln3"])
    out = x @ params["fc_out"]["w"].T + params["fc_out"]["b"]
    return out, attn


# ----------------------------------------------------------------------------
if __name__ == "__main__":
    output_dim = 16      # target vocab
    hid_dim = 32
    n_layers = 2
    n_heads = 4
    pf_dim = 64
    B, trg_len, src_len = 2, 8, 8

    key = jax.random.PRNGKey(0)
    kp, kt, ke = jax.random.split(key, 3)

    params = init_decoder_params(kp, output_dim, hid_dim, n_layers, n_heads, pf_dim)
    prep = prepare_decoder_params(params, n_heads)   # one-time fuse / transpose / stack

    trg_ids = jax.random.randint(kt, (B, trg_len), 0, output_dim, dtype=jnp.int32)
    enc_src = jax.random.normal(ke, (B, src_len, hid_dim), jnp.float32)

    # trg_mask: causal [B, 1, trg_len, trg_len]; src_mask: all-visible [B, 1, 1, src_len]
    causal = jnp.tril(jnp.ones((trg_len, trg_len), jnp.float32))
    trg_mask = jnp.broadcast_to(causal, (B, 1, trg_len, trg_len))
    src_mask = jnp.ones((B, 1, 1, src_len), jnp.float32)

    fwd = jax.jit(functools.partial(decoder_forward, n_layers=n_layers,
                                    n_heads=n_heads, vocab_size=output_dim))
    output, attention = fwd(prep, trg_ids, enc_src, trg_mask, src_mask)
    jax.block_until_ready((output, attention))

    assert output.shape == (B, trg_len, output_dim)
    assert attention.shape == (B, n_heads, trg_len, src_len)

    # correctness check against a pure-JAX reference of the PyTorch module
    ref_out, ref_attn = _reference_forward(params, trg_ids, enc_src, trg_mask,
                                           src_mask, n_heads)
    assert jnp.allclose(output, ref_out, atol=2e-2, rtol=2e-2)
    assert jnp.allclose(attention, ref_attn, atol=2e-2, rtol=2e-2)

    print("KERNEL_OK")
</pallas_src>

<mosaic_0001>
module attributes {stable_mosaic.version = 11 : i64} {
  func.func @_decoder_kernel(%arg0: i32, %arg1: i32, %arg2: memref<8x32xf32, #tpu.memory_space<vmem>>, %arg3: memref<8x32xf32, #tpu.memory_space<vmem>>, %arg4: memref<128x32xf32, #tpu.memory_space<vmem>>, %arg5: memref<1x8x8xf32, #tpu.memory_space<vmem>>, %arg6: memref<1x1x128xf32, #tpu.memory_space<vmem>>, %arg7: memref<1x4x32x8xbf16, #tpu.memory_space<vmem>>, %arg8: memref<1x4x1x8xf32, #tpu.memory_space<vmem>>, %arg9: memref<1x32x64xbf16, #tpu.memory_space<vmem>>, %arg10: memref<1x1x64xf32, #tpu.memory_space<vmem>>, %arg11: memref<1x4x8x32xbf16, #tpu.memory_space<vmem>>, %arg12: memref<1x1x32xf32, #tpu.memory_space<vmem>>, %arg13: memref<1x4x32x8xbf16, #tpu.memory_space<vmem>>, %arg14: memref<1x4x1x8xf32, #tpu.memory_space<vmem>>, %arg15: memref<1x32x64xbf16, #tpu.memory_space<vmem>>, %arg16: memref<1x1x64xf32, #tpu.memory_space<vmem>>, %arg17: memref<1x4x8x32xbf16, #tpu.memory_space<vmem>>, %arg18: memref<1x1x32xf32, #tpu.memory_space<vmem>>, %arg19: memref<1x32x64xbf16, #tpu.memory_space<vmem>>, %arg20: memref<1x1x64xf32, #tpu.memory_space<vmem>>, %arg21: memref<1x64x32xbf16, #tpu.memory_space<vmem>>, %arg22: memref<1x1x32xf32, #tpu.memory_space<vmem>>, %arg23: memref<1x1x32xf32, #tpu.memory_space<vmem>>, %arg24: memref<1x1x32xf32, #tpu.memory_space<vmem>>, %arg25: memref<1x1x32xf32, #tpu.memory_space<vmem>>, %arg26: memref<1x1x32xf32, #tpu.memory_space<vmem>>, %arg27: memref<1x1x32xf32, #tpu.memory_space<vmem>>, %arg28: memref<1x1x32xf32, #tpu.memory_space<vmem>>, %arg29: memref<32x128xbf16, #tpu.memory_space<vmem>>, %arg30: memref<1x128xf32, #tpu.memory_space<vmem>>, %arg31: memref<8x128xf32, #tpu.memory_space<vmem>>, %arg32: memref<1x4x8x128xf32, #tpu.memory_space<vmem>>, %arg33: memref<8x32xf32, #tpu.memory_space<vmem>>) attributes {dimension_semantics = [#tpu.dimension_semantics<parallel>, #tpu.dimension_semantics<arbitrary>], iteration_bounds = array<i64: 2, 2>, scalar_prefetch = 0 : i64, scratch_operands = 1 : i64, tpu.core_type = #tpu.core_type<tc>, window_params = [{transform_indices = @transform_0, window_bounds = array<i64: 8, 32>}, {pipeline_mode = #tpu.pipeline_mode<synchronous>, transform_indices = @transform_1, window_bounds = array<i64: 8, 32>}, {transform_indices = @transform_2, window_bounds = array<i64: 128, 32>}, {transform_indices = @transform_3, window_bounds = array<i64: 1, 8, 8>}, {transform_indices = @transform_4, window_bounds = array<i64: 1, 1, 128>}, {transform_indices = @transform_5, window_bounds = array<i64: 1, 4, 32, 8>}, {transform_indices = @transform_6, window_bounds = array<i64: 1, 4, 1, 8>}, {transform_indices = @transform_7, window_bounds = array<i64: 1, 32, 64>}, {transform_indices = @transform_8, window_bounds = array<i64: 1, 1, 64>}, {transform_indices = @transform_9, window_bounds = array<i64: 1, 4, 8, 32>}, {transform_indices = @transform_10, window_bounds = array<i64: 1, 1, 32>}, {transform_indices = @transform_11, window_bounds = array<i64: 1, 4, 32, 8>}, {transform_indices = @transform_12, window_bounds = array<i64: 1, 4, 1, 8>}, {transform_indices = @transform_13, window_bounds = array<i64: 1, 32, 64>}, {transform_indices = @transform_14, window_bounds = array<i64: 1, 1, 64>}, {transform_indices = @transform_15, window_bounds = array<i64: 1, 4, 8, 32>}, {transform_indices = @transform_16, window_bounds = array<i64: 1, 1, 32>}, {transform_indices = @transform_17, window_bounds = array<i64: 1, 32, 64>}, {transform_indices = @transform_18, window_bounds = array<i64: 1, 1, 64>}, {transform_indices = @transform_19, window_bounds = array<i64: 1, 64, 32>}, {transform_indices = @transform_20, window_bounds = array<i64: 1, 1, 32>}, {transform_indices = @transform_21, window_bounds = array<i64: 1, 1, 32>}, {transform_indices = @transform_22, window_bounds = array<i64: 1, 1, 32>}, {transform_indices = @transform_23, window_bounds = array<i64: 1, 1, 32>}, {transform_indices = @transform_24, window_bounds = array<i64: 1, 1, 32>}, {transform_indices = @transform_25, window_bounds = array<i64: 1, 1, 32>}, {transform_indices = @transform_26, window_bounds = array<i64: 1, 1, 32>}, {pipeline_mode = #tpu.pipeline_mode<synchronous>, transform_indices = @transform_27, window_bounds = array<i64: 32, 128>}, {pipeline_mode = #tpu.pipeline_mode<synchronous>, transform_indices = @transform_28, window_bounds = array<i64: 1, 128>}, {transform_indices = @transform_29, window_bounds = array<i64: 8, 128>}, {transform_indices = @transform_30, window_bounds = array<i64: 1, 4, 8, 128>}]} {
    %c0_i32 = arith.constant 0 : i32
    %0 = arith.cmpi eq, %arg1, %c0_i32 : i32
    %1 = arith.extui %0 : i1 to i32
    %c0_i32_0 = arith.constant 0 : i32
    %2 = arith.cmpi ne, %1, %c0_i32_0 : i32
    scf.if %2 {
      %c0_118 = arith.constant 0 : index
      %c0_119 = arith.constant 0 : index
      %216 = vector.load %arg2[%c0_118, %c0_119] : memref<8x32xf32, #tpu.memory_space<vmem>>, vector<8x32xf32>
      %cst_120 = arith.constant 5.65685415 : f32
      %217 = vector.broadcast %cst_120 : f32 to vector<8x32xf32>
      %218 = arith.mulf %216, %217 : vector<8x32xf32>
      %c0_121 = arith.constant 0 : index
      %c0_122 = arith.constant 0 : index
      %219 = vector.load %arg3[%c0_121, %c0_122] : memref<8x32xf32, #tpu.memory_space<vmem>>, vector<8x32xf32>
      %220 = arith.addf %218, %219 : vector<8x32xf32>
      %c0_123 = arith.constant 0 : index
      %c0_124 = arith.constant 0 : index
      %221 = vector.load %arg33[%c0_123, %c0_124] : memref<8x32xf32, #tpu.memory_space<vmem>>, vector<8x32xf32>
      tpu.vector_store %arg33[%c0_123, %c0_124], %220 {strides = array<i32>} : memref<8x32xf32, #tpu.memory_space<vmem>>, vector<8x32xf32>,
    } else {
    }
    %c0 = arith.constant 0 : index
    %c0_1 = arith.constant 0 : index
    %3 = vector.load %arg33[%c0, %c0_1] : memref<8x32xf32, #tpu.memory_space<vmem>>, vector<8x32xf32>
    %c0_2 = arith.constant 0 : index
    %c0_3 = arith.constant 0 : index
    %4 = vector.load %arg4[%c0_2, %c0_3] : memref<128x32xf32, #tpu.memory_space<vmem>>, vector<128x32xf32>
    %c0_4 = arith.constant 0 : index
    %c0_5 = arith.constant 0 : index
    %c0_6 = arith.constant 0 : index
    %5 = vector.load %arg5[%c0_4, %c0_5, %c0_6] : memref<1x8x8xf32, #tpu.memory_space<vmem>>, vector<1x8x8xf32>
    %6 = vector.shape_cast %5 : vector<1x8x8xf32> to vector<8x8xf32>
    %c0_7 = arith.constant 0 : index
    %c0_8 = arith.constant 0 : index
    %c0_9 = arith.constant 0 : index
    %7 = vector.load %arg6[%c0_7, %c0_8, %c0_9] : memref<1x1x128xf32, #tpu.memory_space<vmem>>, vector<1x1x128xf32>
    %8 = vector.shape_cast %7 : vector<1x1x128xf32> to vector<1x128xf32>
    %c0_10 = arith.constant 0 : index
    %c0_11 = arith.constant 0 : index
    %c0_12 = arith.constant 0 : index
    %c0_13 = arith.constant 0 : index
    %9 = vector.load %arg7[%c0_10, %c0_11, %c0_12, %c0_13] : memref<1x4x32x8xbf16, #tpu.memory_space<vmem>>, vector<1x4x32x8xbf16>
    %10 = vector.shape_cast %9 : vector<1x4x32x8xbf16> to vector<4x32x8xbf16>
    %c0_14 = arith.constant 0 : index
    %c0_15 = arith.constant 0 : index
    %c0_16 = arith.constant 0 : index
    %c0_17 = arith.constant 0 : index
    %11 = vector.load %arg8[%c0_14, %c0_15, %c0_16, %c0_17] : memref<1x4x1x8xf32, #tpu.memory_space<vmem>>, vector<1x4x1x8xf32>
    %12 = vector.shape_cast %11 : vector<1x4x1x8xf32> to vector<4x1x8xf32>
    %c0_18 = arith.constant 0 : index
    %c0_19 = arith.constant 0 : index
    %c0_20 = arith.constant 0 : index
    %13 = vector.load %arg9[%c0_18, %c0_19, %c0_20] : memref<1x32x64xbf16, #tpu.memory_space<vmem>>, vector<1x32x64xbf16>
    %14 = vector.shape_cast %13 : vector<1x32x64xbf16> to vector<32x64xbf16>
    %c0_21 = arith.constant 0 : index
    %c0_22 = arith.constant 0 : index
    %c0_23 = arith.constant 0 : index
    %15 = vector.load %arg10[%c0_21, %c0_22, %c0_23] : memref<1x1x64xf32, #tpu.memory_space<vmem>>, vector<1x1x64xf32>
    %16 = vector.shape_cast %15 : vector<1x1x64xf32> to vector<1x64xf32>
    %c0_24 = arith.constant 0 : index
    %c0_25 = arith.constant 0 : index
    %c0_26 = arith.constant 0 : index
    %c0_27 = arith.constant 0 : index
    %17 = vector.load %arg11[%c0_24, %c0_25, %c0_26, %c0_27] : memref<1x4x8x32xbf16, #tpu.memory_space<vmem>>, vector<1x4x8x32xbf16>
    %18 = vector.shape_cast %17 : vector<1x4x8x32xbf16> to vector<4x8x32xbf16>
    %c0_28 = arith.constant 0 : index
    %c0_29 = arith.constant 0 : index
    %c0_30 = arith.constant 0 : index
    %19 = vector.load %arg12[%c0_28, %c0_29, %c0_30] : memref<1x1x32xf32, #tpu.memory_space<vmem>>, vector<1x1x32xf32>
    %20 = vector.shape_cast %19 : vector<1x1x32xf32> to vector<1x32xf32>
    %21 = arith.truncf %3 : vector<8x32xf32> to vector<8x32xbf16>
    %22 = vector.shape_cast %21 : vector<8x32xbf16> to vector<1x8x32xbf16>
    %23 = vector.shape_cast %22 : vector<1x8x32xbf16> to vector<1x8x32xbf16>
    %24 = vector.broadcast %23 : vector<1x8x32xbf16> to vector<4x8x32xbf16>
    %cst = arith.constant dense<0.000000e+00> : vector<4x8x8xf32>
    %25 = tpu.matmul %24, %10, %cst {dimension_numbers = #tpu.dot_dimension_numbers<[2], [1], [1], [2], [0, 0, 0, 1, 1, 2], [0], [0]>} : vector<4x8x32xbf16>, vector<4x32x8xbf16>, vector<4x8x8xf32> -> vector<4x8x8xf32>
    %26 = vector.broadcast %12 : vector<4x1x8xf32> to vector<4x8x8xf32>
    %27 = arith.addf %25, %26 : vector<4x8x8xf32>
    %28 = arith.truncf %3 : vector<8x32xf32> to vector<8x32xbf16>
    %cst_31 = arith.constant dense<0.000000e+00> : vector<8x64xf32>
    %29 = tpu.matmul %28, %14, %cst_31 {dimension_numbers = #tpu.dot_dimension_numbers<[1], [0], [0], [1], [0, 0, 1, 1], [], []>} : vector<8x32xbf16>, vector<32x64xbf16>, vector<8x64xf32> -> vector<8x64xf32>
    %30 = vector.broadcast %16 : vector<1x64xf32> to vector<8x64xf32>
    %31 = arith.addf %29, %30 : vector<8x64xf32>
    %32 = tpu.transpose %31, [1, 0] : vector<8x64xf32> -> vector<64x8xf32>
    %33 = vector.extract_strided_slice %32 {offsets = [0, 0], sizes = [32, 8], strides = [1, 1]} : vector<64x8xf32> to vector<32x8xf32>
    %34 = vector.shape_cast %33 : vector<32x8xf32> to vector<4x8x8xf32>
    %35 = arith.truncf %34 : vector<4x8x8xf32> to vector<4x8x8xbf16>
    %36 = vector.extract_strided_slice %32 {offsets = [32, 0], sizes = [32, 8], strides = [1, 1]} : vector<64x8xf32> to vector<32x8xf32>
    %37 = vector.shape_cast %36 : vector<32x8xf32> to vector<4x8x8xf32>
    %38 = arith.truncf %37 : vector<4x8x8xf32> to vector<4x8x8xbf16>
    %39 = arith.truncf %27 : vector<4x8x8xf32> to vector<4x8x8xbf16>
    %cst_32 = arith.constant dense<0.000000e+00> : vector<4x8x8xf32>
    %40 = tpu.matmul %39, %35, %cst_32 {dimension_numbers = #tpu.dot_dimension_numbers<[2], [1], [1], [2], [0, 0, 0, 1, 1, 2], [0], [0]>} : vector<4x8x8xbf16>, vector<4x8x8xbf16>, vector<4x8x8xf32> -> vector<4x8x8xf32>
    %41 = vector.shape_cast %6 : vector<8x8xf32> to vector<1x8x8xf32>
    %42 = vector.broadcast %41 : vector<1x8x8xf32> to vector<4x8x8xf32>
    %43 = arith.addf %40, %42 : vector<4x8x8xf32>
    %cst_33 = arith.constant dense<0xFF800000> : vector<4x8xf32>
    %44 = vector.multi_reduction <maximumf>, %43, %cst_33 [2] : vector<4x8x8xf32> to vector<4x8xf32>
    %45 = vector.shape_cast %44 : vector<4x8xf32> to vector<4x8x1xf32>
    %46 = vector.broadcast %45 : vector<4x8x1xf32> to vector<4x8x8xf32>
    %47 = arith.subf %43, %46 : vector<4x8x8xf32>
    %48 = math.exp %47 : vector<4x8x8xf32>
    %cst_34 = arith.constant dense<0.000000e+00> : vector<4x8xf32>
    %49 = vector.multi_reduction <add>, %48, %cst_34 [2] : vector<4x8x8xf32> to vector<4x8xf32>
    %50 = vector.shape_cast %49 : vector<4x8xf32> to vector<4x8x1xf32>
    %51 = tpu.reciprocal %50 {approx = true} : vector<4x8x1xf32> -> vector<4x8x1xf32>
    %52 = vector.broadcast %51 : vector<4x8x1xf32> to vector<4x8x8xf32>
    %53 = arith.mulf %48, %52 : vector<4x8x8xf32>
    %54 = arith.truncf %53 : vector<4x8x8xf32> to vector<4x8x8xbf16>
    %cst_35 = arith.constant dense<0.000000e+00> : vector<4x8x8xf32>
    %55 = tpu.matmul %54, %38, %cst_35 {dimension_numbers = #tpu.dot_dimension_numbers<[2], [2], [1], [1], [0, 0, 0, 1, 1, 1], [0], [0]>} : vector<4x8x8xbf16>, vector<4x8x8xbf16>, vector<4x8x8xf32> -> vector<4x8x8xf32>
    %56 = arith.truncf %55 : vector<4x8x8xf32> to vector<4x8x8xbf16>
    %cst_36 = arith.constant dense<0.000000e+00> : vector<4x8x32xf32>
    %57 = tpu.matmul %56, %18, %cst_36 {dimension_numbers = #tpu.dot_dimension_numbers<[2], [1], [1], [2], [0, 0, 0, 1, 1, 2], [0], [0]>} : vector<4x8x8xbf16>, vector<4x8x32xbf16>, vector<4x8x32xf32> -> vector<4x8x32xf32>
    %cst_37 = arith.constant dense<0.000000e+00> : vector<8x32xf32>
    %58 = vector.multi_reduction <add>, %57, %cst_37 [0] : vector<4x8x32xf32> to vector<8x32xf32>
    %59 = vector.broadcast %20 : vector<1x32xf32> to vector<8x32xf32>
    %60 = arith.addf %58, %59 : vector<8x32xf32>
    %61 = arith.addf %3, %60 : vector<8x32xf32>
    %c0_38 = arith.constant 0 : index
    %c0_39 = arith.constant 0 : index
    %c0_40 = arith.constant 0 : index
    %62 = vector.load %arg23[%c0_38, %c0_39, %c0_40] : memref<1x1x32xf32, #tpu.memory_space<vmem>>, vector<1x1x32xf32>
    %63 = vector.shape_cast %62 : vector<1x1x32xf32> to vector<1x32xf32>
    %c0_41 = arith.constant 0 : index
    %c0_42 = arith.constant 0 : index
    %c0_43 = arith.constant 0 : index
    %64 = vector.load %arg24[%c0_41, %c0_42, %c0_43] : memref<1x1x32xf32, #tpu.memory_space<vmem>>, vector<1x1x32xf32>
    %65 = vector.shape_cast %64 : vector<1x1x32xf32> to vector<1x32xf32>
    %cst_44 = arith.constant dense<0.000000e+00> : vector<8xf32>
    %66 = vector.multi_reduction <add>, %61, %cst_44 [1] : vector<8x32xf32> to vector<8xf32>
    %67 = vector.shape_cast %66 : vector<8xf32> to vector<8x1xf32>
    %cst_45 = arith.constant 3.200000e+01 : f32
    %68 = vector.broadcast %cst_45 : f32 to vector<8x1xf32>
    %69 = arith.divf %67, %68 : vector<8x1xf32>
    %70 = vector.broadcast %69 : vector<8x1xf32> to vector<8x32xf32>
    %71 = arith.subf %61, %70 : vector<8x32xf32>
    %72 = arith.mulf %71, %71 : vector<8x32xf32>
    %cst_46 = arith.constant dense<0.000000e+00> : vector<8xf32>
    %73 = vector.multi_reduction <add>, %72, %cst_46 [1] : vector<8x32xf32> to vector<8xf32>
    %74 = vector.shape_cast %73 : vector<8xf32> to vector<8x1xf32>
    %cst_47 = arith.constant 3.200000e+01 : f32
    %75 = vector.broadcast %cst_47 : f32 to vector<8x1xf32>
    %76 = arith.divf %74, %75 : vector<8x1xf32>
    %77 = vector.broadcast %69 : vector<8x1xf32> to vector<8x32xf32>
    %78 = arith.subf %61, %77 : vector<8x32xf32>
    %cst_48 = arith.constant 9.99999974E-6 : f32
    %79 = vector.broadcast %cst_48 : f32 to vector<8x1xf32>
    %80 = arith.addf %76, %79 : vector<8x1xf32>
    %81 = math.rsqrt %80 : vector<8x1xf32>
    %82 = vector.broadcast %81 : vector<8x1xf32> to vector<8x32xf32>
    %83 = arith.mulf %78, %82 : vector<8x32xf32>
    %84 = vector.broadcast %63 : vector<1x32xf32> to vector<8x32xf32>
    %85 = arith.mulf %83, %84 : vector<8x32xf32>
    %86 = vector.broadcast %65 : vector<1x32xf32> to vector<8x32xf32>
    %87 = arith.addf %85, %86 : vector<8x32xf32>
    %c0_49 = arith.constant 0 : index
    %c0_50 = arith.constant 0 : index
    %c0_51 = arith.constant 0 : index
    %c0_52 = arith.constant 0 : index
    %88 = vector.load %arg13[%c0_49, %c0_50, %c0_51, %c0_52] : memref<1x4x32x8xbf16, #tpu.memory_space<vmem>>, vector<1x4x32x8xbf16>
    %89 = vector.shape_cast %88 : vector<1x4x32x8xbf16> to vector<4x32x8xbf16>
    %c0_53 = arith.constant 0 : index
    %c0_54 = arith.constant 0 : index
    %c0_55 = arith.constant 0 : index
    %c0_56 = arith.constant 0 : index
    %90 = vector.load %arg14[%c0_53, %c0_54, %c0_55, %c0_56] : memref<1x4x1x8xf32, #tpu.memory_space<vmem>>, vector<1x4x1x8xf32>
    %91 = vector.shape_cast %90 : vector<1x4x1x8xf32> to vector<4x1x8xf32>
    %c0_57 = arith.constant 0 : index
    %c0_58 = arith.constant 0 : index
    %c0_59 = arith.constant 0 : index
    %92 = vector.load %arg15[%c0_57, %c0_58, %c0_59] : memref<1x32x64xbf16, #tpu.memory_space<vmem>>, vector<1x32x64xbf16>
    %93 = vector.shape_cast %92 : vector<1x32x64xbf16> to vector<32x64xbf16>
    %c0_60 = arith.constant 0 : index
    %c0_61 = arith.constant 0 : index
    %c0_62 = arith.constant 0 : index
    %94 = vector.load %arg16[%c0_60, %c0_61, %c0_62] : memref<1x1x64xf32, #tpu.memory_space<vmem>>, vector<1x1x64xf32>
    %95 = vector.shape_cast %94 : vector<1x1x64xf32> to vector<1x64xf32>
    %c0_63 = arith.constant 0 : index
    %c0_64 = arith.constant 0 : index
    %c0_65 = arith.constant 0 : index
    %c0_66 = arith.constant 0 : index
    %96 = vector.load %arg17[%c0_63, %c0_64, %c0_65, %c0_66] : memref<1x4x8x32xbf16, #tpu.memory_space<vmem>>, vector<1x4x8x32xbf16>
    %97 = vector.shape_cast %96 : vector<1x4x8x32xbf16> to vector<4x8x32xbf16>
    %c0_67 = arith.constant 0 : index
    %c0_68 = arith.constant 0 : index
    %c0_69 = arith.constant 0 : index
    %98 = vector.load %arg18[%c0_67, %c0_68, %c0_69] : memref<1x1x32xf32, #tpu.memory_space<vmem>>, vector<1x1x32xf32>
    %99 = vector.shape_cast %98 : vector<1x1x32xf32> to vector<1x32xf32>
    %100 = arith.truncf %87 : vector<8x32xf32> to vector<8x32xbf16>
    %101 = vector.shape_cast %100 : vector<8x32xbf16> to vector<1x8x32xbf16>
    %102 = vector.shape_cast %101 : vector<1x8x32xbf16> to vector<1x8x32xbf16>
    %103 = vector.broadcast %102 : vector<1x8x32xbf16> to vector<4x8x32xbf16>
    %cst_70 = arith.constant dense<0.000000e+00> : vector<4x8x8xf32>
    %104 = tpu.matmul %103, %89, %cst_70 {dimension_numbers = #tpu.dot_dimension_numbers<[2], [1], [1], [2], [0, 0, 0, 1, 1, 2], [0], [0]>} : vector<4x8x32xbf16>, vector<4x32x8xbf16>, vector<4x8x8xf32> -> vector<4x8x8xf32>
    %105 = vector.broadcast %91 : vector<4x1x8xf32> to vector<4x8x8xf32>
    %106 = arith.addf %104, %105 : vector<4x8x8xf32>
    %107 = arith.truncf %4 : vector<128x32xf32> to vector<128x32xbf16>
    %cst_71 = arith.constant dense<0.000000e+00> : vector<128x64xf32>
    %108 = tpu.matmul %107, %93, %cst_71 {dimension_numbers = #tpu.dot_dimension_numbers<[1], [0], [0], [1], [0, 0, 1, 1], [], []>} : vector<128x32xbf16>, vector<32x64xbf16>, vector<128x64xf32> -> vector<128x64xf32>
    %109 = vector.broadcast %95 : vector<1x64xf32> to vector<128x64xf32>
    %110 = arith.addf %108, %109 : vector<128x64xf32>
    %111 = tpu.transpose %110, [1, 0] : vector<128x64xf32> -> vector<64x128xf32>
    %112 = vector.extract_strided_slice %111 {offsets = [0, 0], sizes = [32, 128], strides = [1, 1]} : vector<64x128xf32> to vector<32x128xf32>
    %113 = vector.shape_cast %112 : vector<32x128xf32> to vector<4x8x128xf32>
    %114 = arith.truncf %113 : vector<4x8x128xf32> to vector<4x8x128xbf16>
    %115 = vector.extract_strided_slice %111 {offsets = [32, 0], sizes = [32, 128], strides = [1, 1]} : vector<64x128xf32> to vector<32x128xf32>
    %116 = vector.shape_cast %115 : vector<32x128xf32> to vector<4x8x128xf32>
    %117 = arith.truncf %116 : vector<4x8x128xf32> to vector<4x8x128xbf16>
    %118 = arith.truncf %106 : vector<4x8x8xf32> to vector<4x8x8xbf16>
    %cst_72 = arith.constant dense<0.000000e+00> : vector<4x8x128xf32>
    %119 = tpu.matmul %118, %114, %cst_72 {dimension_numbers = #tpu.dot_dimension_numbers<[2], [1], [1], [2], [0, 0, 0, 1, 1, 2], [0], [0]>} : vector<4x8x8xbf16>, vector<4x8x128xbf16>, vector<4x8x128xf32> -> vector<4x8x128xf32>
    %120 = vector.shape_cast %8 : vector<1x128xf32> to vector<1x1x128xf32>
    %121 = vector.broadcast %120 : vector<1x1x128xf32> to vector<4x8x128xf32>
    %122 = arith.addf %119, %121 : vector<4x8x128xf32>
    %cst_73 = arith.constant dense<0xFF800000> : vector<4x8xf32>
    %123 = vector.multi_reduction <maximumf>, %122, %cst_73 [2] : vector<4x8x128xf32> to vector<4x8xf32>
    %124 = vector.shape_cast %123 : vector<4x8xf32> to vector<4x8x1xf32>
    %125 = vector.broadcast %124 : vector<4x8x1xf32> to vector<4x8x128xf32>
    %126 = arith.subf %122, %125 : vector<4x8x128xf32>
    %127 = math.exp %126 : vector<4x8x128xf32>
    %cst_74 = arith.constant dense<0.000000e+00> : vector<4x8xf32>
    %128 = vector.multi_reduction <add>, %127, %cst_74 [2] : vector<4x8x128xf32> to vector<4x8xf32>
    %129 = vector.shape_cast %128 : vector<4x8xf32> to vector<4x8x1xf32>
    %130 = tpu.reciprocal %129 {approx = true} : vector<4x8x1xf32> -> vector<4x8x1xf32>
    %131 = vector.broadcast %130 : vector<4x8x1xf32> to vector<4x8x128xf32>
    %132 = arith.mulf %127, %131 : vector<4x8x128xf32>
    %133 = arith.truncf %132 : vector<4x8x128xf32> to vector<4x8x128xbf16>
    %cst_75 = arith.constant dense<0.000000e+00> : vector<4x8x8xf32>
    %134 = tpu.matmul %133, %117, %cst_75 {dimension_numbers = #tpu.dot_dimension_numbers<[2], [2], [1], [1], [0, 0, 0, 1, 1, 1], [0], [0]>} : vector<4x8x128xbf16>, vector<4x8x128xbf16>, vector<4x8x8xf32> -> vector<4x8x8xf32>
    %135 = arith.truncf %134 : vector<4x8x8xf32> to vector<4x8x8xbf16>
    %cst_76 = arith.constant dense<0.000000e+00> : vector<4x8x32xf32>
    %136 = tpu.matmul %135, %97, %cst_76 {dimension_numbers = #tpu.dot_dimension_numbers<[2], [1], [1], [2], [0, 0, 0, 1, 1, 2], [0], [0]>} : vector<4x8x8xbf16>, vector<4x8x32xbf16>, vector<4x8x32xf32> -> vector<4x8x32xf32>
    %cst_77 = arith.constant dense<0.000000e+00> : vector<8x32xf32>
    %137 = vector.multi_reduction <add>, %136, %cst_77 [0] : vector<4x8x32xf32> to vector<8x32xf32>
    %138 = vector.broadcast %99 : vector<1x32xf32> to vector<8x32xf32>
    %139 = arith.addf %137, %138 : vector<8x32xf32>
    %140 = arith.addf %87, %139 : vector<8x32xf32>
    %c0_78 = arith.constant 0 : index
    %c0_79 = arith.constant 0 : index
    %c0_80 = arith.constant 0 : index
    %141 = vector.load %arg25[%c0_78, %c0_79, %c0_80] : memref<1x1x32xf32, #tpu.memory_space<vmem>>, vector<1x1x32xf32>
    %142 = vector.shape_cast %141 : vector<1x1x32xf32> to vector<1x32xf32>
    %c0_81 = arith.constant 0 : index
    %c0_82 = arith.constant 0 : index
    %c0_83 = arith.constant 0 : index
    %143 = vector.load %arg26[%c0_81, %c0_82, %c0_83] : memref<1x1x32xf32, #tpu.memory_space<vmem>>, vector<1x1x32xf32>
    %144 = vector.shape_cast %143 : vector<1x1x32xf32> to vector<1x32xf32>
    %cst_84 = arith.constant dense<0.000000e+00> : vector<8xf32>
    %145 = vector.multi_reduction <add>, %140, %cst_84 [1] : vector<8x32xf32> to vector<8xf32>
    %146 = vector.shape_cast %145 : vector<8xf32> to vector<8x1xf32>
    %cst_85 = arith.constant 3.200000e+01 : f32
    %147 = vector.broadcast %cst_85 : f32 to vector<8x1xf32>
    %148 = arith.divf %146, %147 : vector<8x1xf32>
    %149 = vector.broadcast %148 : vector<8x1xf32> to vector<8x32xf32>
    %150 = arith.subf %140, %149 : vector<8x32xf32>
    %151 = arith.mulf %150, %150 : vector<8x32xf32>
    %cst_86 = arith.constant dense<0.000000e+00> : vector<8xf32>
    %152 = vector.multi_reduction <add>, %151, %cst_86 [1] : vector<8x32xf32> to vector<8xf32>
    %153 = vector.shape_cast %152 : vector<8xf32> to vector<8x1xf32>
    %cst_87 = arith.constant 3.200000e+01 : f32
    %154 = vector.broadcast %cst_87 : f32 to vector<8x1xf32>
    %155 = arith.divf %153, %154 : vector<8x1xf32>
    %156 = vector.broadcast %148 : vector<8x1xf32> to vector<8x32xf32>
    %157 = arith.subf %140, %156 : vector<8x32xf32>
    %cst_88 = arith.constant 9.99999974E-6 : f32
    %158 = vector.broadcast %cst_88 : f32 to vector<8x1xf32>
    %159 = arith.addf %155, %158 : vector<8x1xf32>
    %160 = math.rsqrt %159 : vector<8x1xf32>
    %161 = vector.broadcast %160 : vector<8x1xf32> to vector<8x32xf32>
    %162 = arith.mulf %157, %161 : vector<8x32xf32>
    %163 = vector.broadcast %142 : vector<1x32xf32> to vector<8x32xf32>
    %164 = arith.mulf %162, %163 : vector<8x32xf32>
    %165 = vector.broadcast %144 : vector<1x32xf32> to vector<8x32xf32>
    %166 = arith.addf %164, %165 : vector<8x32xf32>
    %167 = arith.truncf %166 : vector<8x32xf32> to vector<8x32xbf16>
    %c0_89 = arith.constant 0 : index
    %c0_90 = arith.constant 0 : index
    %c0_91 = arith.constant 0 : index
    %168 = vector.load %arg19[%c0_89, %c0_90, %c0_91] : memref<1x32x64xbf16, #tpu.memory_space<vmem>>, vector<1x32x64xbf16>
    %169 = vector.shape_cast %168 : vector<1x32x64xbf16> to vector<32x64xbf16>
    %cst_92 = arith.constant dense<0.000000e+00> : vector<8x64xf32>
    %170 = tpu.matmul %167, %169, %cst_92 {dimension_numbers = #tpu.dot_dimension_numbers<[1], [0], [0], [1], [0, 0, 1, 1], [], []>} : vector<8x32xbf16>, vector<32x64xbf16>, vector<8x64xf32> -> vector<8x64xf32>
    %c0_93 = arith.constant 0 : index
    %c0_94 = arith.constant 0 : index
    %c0_95 = arith.constant 0 : index
    %171 = vector.load %arg20[%c0_93, %c0_94, %c0_95] : memref<1x1x64xf32, #tpu.memory_space<vmem>>, vector<1x1x64xf32>
    %172 = vector.shape_cast %171 : vector<1x1x64xf32> to vector<1x64xf32>
    %173 = vector.broadcast %172 : vector<1x64xf32> to vector<8x64xf32>
    %174 = arith.addf %170, %173 : vector<8x64xf32>
    %cst_96 = arith.constant 0.000000e+00 : f32
    %175 = vector.broadcast %cst_96 : f32 to vector<8x64xf32>
    %176 = arith.maximumf %174, %175 : vector<8x64xf32>
    %177 = arith.truncf %176 : vector<8x64xf32> to vector<8x64xbf16>
    %c0_97 = arith.constant 0 : index
    %c0_98 = arith.constant 0 : index
    %c0_99 = arith.constant 0 : index
    %178 = vector.load %arg21[%c0_97, %c0_98, %c0_99] : memref<1x64x32xbf16, #tpu.memory_space<vmem>>, vector<1x64x32xbf16>
    %179 = vector.shape_cast %178 : vector<1x64x32xbf16> to vector<64x32xbf16>
    %cst_100 = arith.constant dense<0.000000e+00> : vector<8x32xf32>
    %180 = tpu.matmul %177, %179, %cst_100 {dimension_numbers = #tpu.dot_dimension_numbers<[1], [0], [0], [1], [0, 0, 1, 1], [], []>} : vector<8x64xbf16>, vector<64x32xbf16>, vector<8x32xf32> -> vector<8x32xf32>
    %c0_101 = arith.constant 0 : index
    %c0_102 = arith.constant 0 : index
    %c0_103 = arith.constant 0 : index
    %181 = vector.load %arg22[%c0_101, %c0_102, %c0_103] : memref<1x1x32xf32, #tpu.memory_space<vmem>>, vector<1x1x32xf32>
    %182 = vector.shape_cast %181 : vector<1x1x32xf32> to vector<1x32xf32>
    %183 = vector.broadcast %182 : vector<1x32xf32> to vector<8x32xf32>
    %184 = arith.addf %180, %183 : vector<8x32xf32>
    %185 = arith.addf %166, %184 : vector<8x32xf32>
    %c0_104 = arith.constant 0 : index
    %c0_105 = arith.constant 0 : index
    %c0_106 = arith.constant 0 : index
    %186 = vector.load %arg27[%c0_104, %c0_105, %c0_106] : memref<1x1x32xf32, #tpu.memory_space<vmem>>, vector<1x1x32xf32>
    %187 = vector.shape_cast %186 : vector<1x1x32xf32> to vector<1x32xf32>
    %c0_107 = arith.constant 0 : index
    %c0_108 = arith.constant 0 : index
    %c0_109 = arith.constant 0 : index
    %188 = vector.load %arg28[%c0_107, %c0_108, %c0_109] : memref<1x1x32xf32, #tpu.memory_space<vmem>>, vector<1x1x32xf32>
    %189 = vector.shape_cast %188 : vector<1x1x32xf32> to vector<1x32xf32>
    %cst_110 = arith.constant dense<0.000000e+00> : vector<8xf32>
    %190 = vector.multi_reduction <add>, %185, %cst_110 [1] : vector<8x32xf32> to vector<8xf32>
    %191 = vector.shape_cast %190 : vector<8xf32> to vector<8x1xf32>
    %cst_111 = arith.constant 3.200000e+01 : f32
    %192 = vector.broadcast %cst_111 : f32 to vector<8x1xf32>
    %193 = arith.divf %191, %192 : vector<8x1xf32>
    %194 = vector.broadcast %193 : vector<8x1xf32> to vector<8x32xf32>
    %195 = arith.subf %185, %194 : vector<8x32xf32>
    %196 = arith.mulf %195, %195 : vector<8x32xf32>
    %cst_112 = arith.constant dense<0.000000e+00> : vector<8xf32>
    %197 = vector.multi_reduction <add>, %196, %cst_112 [1] : vector<8x32xf32> to vector<8xf32>
    %198 = vector.shape_cast %197 : vector<8xf32> to vector<8x1xf32>
    %cst_113 = arith.constant 3.200000e+01 : f32
    %199 = vector.broadcast %cst_113 : f32 to vector<8x1xf32>
    %200 = arith.divf %198, %199 : vector<8x1xf32>
    %201 = vector.broadcast %193 : vector<8x1xf32> to vector<8x32xf32>
    %202 = arith.subf %185, %201 : vector<8x32xf32>
    %cst_114 = arith.constant 9.99999974E-6 : f32
    %203 = vector.broadcast %cst_114 : f32 to vector<8x1xf32>
    %204 = arith.addf %200, %203 : vector<8x1xf32>
    %205 = math.rsqrt %204 : vector<8x1xf32>
    %206 = vector.broadcast %205 : vector<8x1xf32> to vector<8x32xf32>
    %207 = arith.mulf %202, %206 : vector<8x32xf32>
    %208 = vector.broadcast %187 : vector<1x32xf32> to vector<8x32xf32>
    %209 = arith.mulf %207, %208 : vector<8x32xf32>
    %210 = vector.broadcast %189 : vector<1x32xf32> to vector<8x32xf32>
    %211 = arith.addf %209, %210 : vector<8x32xf32>
    %c0_115 = arith.constant 0 : index
    %c0_116 = arith.constant 0 : index
    %212 = vector.load %arg33[%c0_115, %c0_116] : memref<8x32xf32, #tpu.memory_space<vmem>>, vector<8x32xf32>
    tpu.vector_store %arg33[%c0_115, %c0_116], %211 {strides = array<i32>} : memref<8x32xf32, #tpu.memory_space<vmem>>, vector<8x32xf32>,
    %c1_i32 = arith.constant 1 : i32
    %213 = arith.cmpi eq, %arg1, %c1_i32 : i32
    %214 = arith.extui %213 : i1 to i32
    %c0_i32_117 = arith.constant 0 : i32
    %215 = arith.cmpi ne, %214, %c0_i32_117 : i32
    scf.if %215 {
      %216 = arith.truncf %211 : vector<8x32xf32> to vector<8x32xbf16>
      %c0_118 = arith.constant 0 : index
      %c0_119 = arith.constant 0 : index
      %217 = vector.load %arg29[%c0_118, %c0_119] : memref<32x128xbf16, #tpu.memory_space<vmem>>, vector<32x128xbf16>
      %cst_120 = arith.constant dense<0.000000e+00> : vector<8x128xf32>
      %218 = tpu.matmul %216, %217, %cst_120 {dimension_numbers = #tpu.dot_dimension_numbers<[1], [0], [0], [1], [0, 0, 1, 1], [], []>} : vector<8x32xbf16>, vector<32x128xbf16>, vector<8x128xf32> -> vector<8x128xf32>
      %c0_121 = arith.constant 0 : index
      %c0_122 = arith.constant 0 : index
      %219 = vector.load %arg30[%c0_121, %c0_122] : memref<1x128xf32, #tpu.memory_space<vmem>>, vector<1x128xf32>
      %220 = vector.broadcast %219 : vector<1x128xf32> to vector<8x128xf32>
      %221 = arith.addf %218, %220 : vector<8x128xf32>
      %c0_123 = arith.constant 0 : index
      %c0_124 = arith.constant 0 : index
      %222 = vector.load %arg31[%c0_123, %c0_124] : memref<8x128xf32, #tpu.memory_space<vmem>>, vector<8x128xf32>
      tpu.vector_store %arg31[%c0_123, %c0_124], %221 {strides = array<i32>} : memref<8x128xf32, #tpu.memory_space<vmem>>, vector<8x128xf32>,
      %c0_125 = arith.constant 0 : index
      %c0_126 = arith.constant 0 : index
      %c0_127 = arith.constant 0 : index
      %c0_128 = arith.constant 0 : index
      %223 = vector.load %arg32[%c0_125, %c0_126, %c0_127, %c0_128] : memref<1x4x8x128xf32, #tpu.memory_space<vmem>>, vector<1x4x8x128xf32>
      %224 = vector.shape_cast %223 : vector<1x4x8x128xf32> to vector<4x8x128xf32>
      %225 = vector.shape_cast %132 : vector<4x8x128xf32> to vector<1x4x8x128xf32>
      tpu.vector_store %arg32[%c0_125, %c0_126, %c0_127, %c0_128], %225 {strides = array<i32>} : memref<1x4x8x128xf32, #tpu.memory_space<vmem>>, vector<1x4x8x128xf32>,
    } else {
    }
    return
  }
  func.func @transform_0(%arg0: i32, %arg1: i32) -> (i32, i32) {
    %c0_i32 = arith.constant 0 : i32
    %c0_i32_0 = arith.constant 0 : i32
    return %arg0, %c0_i32 : i32, i32
  }
  func.func @transform_1(%arg0: i32, %arg1: i32) -> (i32, i32) {
    %c0_i32 = arith.constant 0 : i32
    %c0_i32_0 = arith.constant 0 : i32
    %c0_i32_1 = arith.constant 0 : i32
    return %c0_i32, %c0_i32_0 : i32, i32
  }
  func.func @transform_2(%arg0: i32, %arg1: i32) -> (i32, i32) {
    %c0_i32 = arith.constant 0 : i32
    %c0_i32_0 = arith.constant 0 : i32
    return %arg0, %c0_i32 : i32, i32
  }
  func.func @transform_3(%arg0: i32, %arg1: i32) -> (i32, i32, i32) {
    %c0_i32 = arith.constant 0 : i32
    %c0_i32_0 = arith.constant 0 : i32
    %c0_i32_1 = arith.constant 0 : i32
    return %arg0, %c0_i32, %c0_i32_0 : i32, i32, i32
  }
  func.func @transform_4(%arg0: i32, %arg1: i32) -> (i32, i32, i32) {
    %c0_i32 = arith.constant 0 : i32
    %c0_i32_0 = arith.constant 0 : i32
    %c0_i32_1 = arith.constant 0 : i32
    return %arg0, %c0_i32, %c0_i32_0 : i32, i32, i32
  }
  func.func @transform_5(%arg0: i32, %arg1: i32) -> (i32, i32, i32, i32) {
    %c0_i32 = arith.constant 0 : i32
    %c0_i32_0 = arith.constant 0 : i32
    %c0_i32_1 = arith.constant 0 : i32
    %c0_i32_2 = arith.constant 0 : i32
    return %arg1, %c0_i32, %c0_i32_0, %c0_i32_1 : i32, i32, i32, i32
  }
  func.func @transform_6(%arg0: i32, %arg1: i32) -> (i32, i32, i32, i32) {
    %c0_i32 = arith.constant 0 : i32
    %c0_i32_0 = arith.constant 0 : i32
    %c0_i32_1 = arith.constant 0 : i32
    %c0_i32_2 = arith.constant 0 : i32
    return %arg1, %c0_i32, %c0_i32_0, %c0_i32_1 : i32, i32, i32, i32
  }
  func.func @transform_7(%arg0: i32, %arg1: i32) -> (i32, i32, i32) {
    %c0_i32 = arith.constant 0 : i32
    %c0_i32_0 = arith.constant 0 : i32
    %c0_i32_1 = arith.constant 0 : i32
    return %arg1, %c0_i32, %c0_i32_0 : i32, i32, i32
  }
  func.func @transform_8(%arg0: i32, %arg1: i32) -> (i32, i32, i32) {
    %c0_i32 = arith.constant 0 : i32
    %c0_i32_0 = arith.constant 0 : i32
    %c0_i32_1 = arith.constant 0 : i32
    return %arg1, %c0_i32, %c0_i32_0 : i32, i32, i32
  }
  func.func @transform_9(%arg0: i32, %arg1: i32) -> (i32, i32, i32, i32) {
    %c0_i32 = arith.constant 0 : i32
    %c0_i32_0 = arith.constant 0 : i32
    %c0_i32_1 = arith.constant 0 : i32
    %c0_i32_2 = arith.constant 0 : i32
    return %arg1, %c0_i32, %c0_i32_0, %c0_i32_1 : i32, i32, i32, i32
  }
  func.func @transform_10(%arg0: i32, %arg1: i32) -> (i32, i32, i32) {
    %c0_i32 = arith.constant 0 : i32
    %c0_i32_0 = arith.constant 0 : i32
    %c0_i32_1 = arith.constant 0 : i32
    return %arg1, %c0_i32, %c0_i32_0 : i32, i32, i32
  }
  func.func @transform_11(%arg0: i32, %arg1: i32) -> (i32, i32, i32, i32) {
    %c0_i32 = arith.constant 0 : i32
    %c0_i32_0 = arith.constant 0 : i32
    %c0_i32_1 = arith.constant 0 : i32
    %c0_i32_2 = arith.constant 0 : i32
    return %arg1, %c0_i32, %c0_i32_0, %c0_i32_1 : i32, i32, i32, i32
  }
  func.func @transform_12(%arg0: i32, %arg1: i32) -> (i32, i32, i32, i32) {
    %c0_i32 = arith.constant 0 : i32
    %c0_i32_0 = arith.constant 0 : i32
    %c0_i32_1 = arith.constant 0 : i32
    %c0_i32_2 = arith.constant 0 : i32
    return %arg1, %c0_i32, %c0_i32_0, %c0_i32_1 : i32, i32, i32, i32
  }
  func.func @transform_13(%arg0: i32, %arg1: i32) -> (i32, i32, i32) {
    %c0_i32 = arith.constant 0 : i32
    %c0_i32_0 = arith.constant 0 : i32
    %c0_i32_1 = arith.constant 0 : i32
    return %arg1, %c0_i32, %c0_i32_0 : i32, i32, i32
  }
  func.func @transform_14(%arg0: i32, %arg1: i32) -> (i32, i32, i32) {
    %c0_i32 = arith.constant 0 : i32
    %c0_i32_0 = arith.constant 0 : i32
    %c0_i32_1 = arith.constant 0 : i32
    return %arg1, %c0_i32, %c0_i32_0 : i32, i32, i32
  }
  func.func @transform_15(%arg0: i32, %arg1: i32) -> (i32, i32, i32, i32) {
    %c0_i32 = arith.constant 0 : i32
    %c0_i32_0 = arith.constant 0 : i32
    %c0_i32_1 = arith.constant 0 : i32
    %c0_i32_2 = arith.constant 0 : i32
    return %arg1, %c0_i32, %c0_i32_0, %c0_i32_1 : i32, i32, i32, i32
  }
  func.func @transform_16(%arg0: i32, %arg1: i32) -> (i32, i32, i32) {
    %c0_i32 = arith.constant 0 : i32
    %c0_i32_0 = arith.constant 0 : i32
    %c0_i32_1 = arith.constant 0 : i32
    return %arg1, %c0_i32, %c0_i32_0 : i32, i32, i32
  }
  func.func @transform_17(%arg0: i32, %arg1: i32) -> (i32, i32, i32) {
    %c0_i32 = arith.constant 0 : i32
    %c0_i32_0 = arith.constant 0 : i32
    %c0_i32_1 = arith.constant 0 : i32
    return %arg1, %c0_i32, %c0_i32_0 : i32, i32, i32
  }
  func.func @transform_18(%arg0: i32, %arg1: i32) -> (i32, i32, i32) {
    %c0_i32 = arith.constant 0 : i32
    %c0_i32_0 = arith.constant 0 : i32
    %c0_i32_1 = arith.constant 0 : i32
    return %arg1, %c0_i32, %c0_i32_0 : i32, i32, i32
  }
  func.func @transform_19(%arg0: i32, %arg1: i32) -> (i32, i32, i32) {
    %c0_i32 = arith.constant 0 : i32
    %c0_i32_0 = arith.constant 0 : i32
    %c0_i32_1 = arith.constant 0 : i32
    return %arg1, %c0_i32, %c0_i32_0 : i32, i32, i32
  }
  func.func @transform_20(%arg0: i32, %arg1: i32) -> (i32, i32, i32) {
    %c0_i32 = arith.constant 0 : i32
    %c0_i32_0 = arith.constant 0 : i32
    %c0_i32_1 = arith.constant 0 : i32
    return %arg1, %c0_i32, %c0_i32_0 : i32, i32, i32
  }
  func.func @transform_21(%arg0: i32, %arg1: i32) -> (i32, i32, i32) {
    %c0_i32 = arith.constant 0 : i32
    %c0_i32_0 = arith.constant 0 : i32
    %c0_i32_1 = arith.constant 0 : i32
    return %arg1, %c0_i32, %c0_i32_0 : i32, i32, i32
  }
  func.func @transform_22(%arg0: i32, %arg1: i32) -> (i32, i32, i32) {
    %c0_i32 = arith.constant 0 : i32
    %c0_i32_0 = arith.constant 0 : i32
    %c0_i32_1 = arith.constant 0 : i32
    return %arg1, %c0_i32, %c0_i32_0 : i32, i32, i32
  }
  func.func @transform_23(%arg0: i32, %arg1: i32) -> (i32, i32, i32) {
    %c0_i32 = arith.constant 0 : i32
    %c0_i32_0 = arith.constant 0 : i32
    %c0_i32_1 = arith.constant 0 : i32
    return %arg1, %c0_i32, %c0_i32_0 : i32, i32, i32
  }
  func.func @transform_24(%arg0: i32, %arg1: i32) -> (i32, i32, i32) {
    %c0_i32 = arith.constant 0 : i32
    %c0_i32_0 = arith.constant 0 : i32
    %c0_i32_1 = arith.constant 0 : i32
    return %arg1, %c0_i32, %c0_i32_0 : i32, i32, i32
  }
  func.func @transform_25(%arg0: i32, %arg1: i32) -> (i32, i32, i32) {
    %c0_i32 = arith.constant 0 : i32
    %c0_i32_0 = arith.constant 0 : i32
    %c0_i32_1 = arith.constant 0 : i32
    return %arg1, %c0_i32, %c0_i32_0 : i32, i32, i32
  }
  func.func @transform_26(%arg0: i32, %arg1: i32) -> (i32, i32, i32) {
    %c0_i32 = arith.constant 0 : i32
    %c0_i32_0 = arith.constant 0 : i32
    %c0_i32_1 = arith.constant 0 : i32
    return %arg1, %c0_i32, %c0_i32_0 : i32, i32, i32
  }
  func.func @transform_27(%arg0: i32, %arg1: i32) -> (i32, i32) {
    %c0_i32 = arith.constant 0 : i32
    %c0_i32_0 = arith.constant 0 : i32
    %c0_i32_1 = arith.constant 0 : i32
    return %c0_i32, %c0_i32_0 : i32, i32
  }
  func.func @transform_28(%arg0: i32, %arg1: i32) -> (i32, i32) {
    %c0_i32 = arith.constant 0 : i32
    %c0_i32_0 = arith.constant 0 : i32
    %c0_i32_1 = arith.constant 0 : i32
    return %c0_i32, %c0_i32_0 : i32, i32
  }
  func.func @transform_29(%arg0: i32, %arg1: i32) -> (i32, i32) {
    %c0_i32 = arith.constant 0 : i32
    %c0_i32_0 = arith.constant 0 : i32
    return %arg0, %c0_i32 : i32, i32
  }
  func.func @transform_30(%arg0: i32, %arg1: i32) -> (i32, i32, i32, i32) {
    %c0_i32 = arith.constant 0 : i32
    %c0_i32_0 = arith.constant 0 : i32
    %c0_i32_1 = arith.constant 0 : i32
    %c0_i32_2 = arith.constant 0 : i32
    return %arg0, %c0_i32, %c0_i32_0, %c0_i32_1 : i32, i32, i32, i32
  }
}

</mosaic_0001>

<bundles_post_ra>
// kernel: decoder_forward.1
= control target key start
LH: loop header
LB: loop body
LE: loop exit
PB: predicated region body
PF: predicated region fallthrough
CT: control target
= control target key end

     0   :  { %s4925_s6 = smov 1   ;;  %s4926_s10 = smov 2   ;;  %s5695_s0 = inlined_call_operand.smem [shape: u32[31], index: -1, kind: input, shape index: {}] }
   0x1   :  { %s4970_s5 = sld [smem:[%s5695_s0]]   ;;  %s4927_s14 = smov 3  }
   0x2   :  { %s4975_s9 = sld [smem:[%s5695_s0 + %s4925_s6]]   ;;  %s4928_s18 = smov 4  }
   0x3   :  { %s4980_s13 = sld [smem:[%s5695_s0 + %s4926_s10]]   ;;  %s4929_s22 = smov 5  }
   0x4   :  { %s4985_s17 = sld [smem:[%s5695_s0 + %s4927_s14]]   ;;  %s4930_s26 = smov 6  }
   0x5   :  { %s4990_s21 = sld [smem:[%s5695_s0 + %s4928_s18]]   ;;  %s4931_s30 = smov 7  }
   0x6   :  { %s4995_s25 = sld [smem:[%s5695_s0 + %s4929_s22]]   ;;  %s4932_s4 = smov 8  }
   0x7   :  { %5722 = sst [smem:[#allocation6_spill]] %s4970_s5  ;;  %s4933_s10 = smov 9  }
   0x8   :  { %5723 = sst [smem:[#allocation7_spill]] %s4975_s9  ;;  %s4934_s15 = smov 10  }
   0x9   :  { %5724 = sst [smem:[#allocation8_spill]] %s4980_s13  ;;  %s4935_s20 = smov 11  }
   0xa   :  { %5725 = sst [smem:[#allocation9_spill]] %s4985_s17  ;;  %s4937_s1 = smov 13  }
   0xb   :  { %5726 = sst [smem:[#allocation10_spill]] %s4990_s21  ;;  %s4938_s7 = smov 14  }
   0xc   :  { %5727 = sst [smem:[#allocation11_spill]] %s4995_s25  ;;  %s4940_s22 = smov 16  }
   0xd   :  { %s5000_s29 = sld [smem:[%s5695_s0 + %s4930_s26]]   ;;  %s4936_s26 = smov 12  }
   0xe   :  { %s5005_s3 = sld [smem:[%s5695_s0 + %s4931_s30]]   ;;  %s4941_s28 = smov 17  }
   0xf   :  { %s5010_s8 = sld [smem:[%s5695_s0 + %s4932_s4]]  }
  0x10   :  { %s5015_s14 = sld [smem:[%s5695_s0 + %s4933_s10]]  }
  0x11   :  { %s5020_s19 = sld [smem:[%s5695_s0 + %s4934_s15]]   ;;  %s4939_s15 = smov 15  }
  0x12   :  { %s5025_s24 = sld [smem:[%s5695_s0 + %s4935_s20]]  }
  0x13   :  { %5728 = sst [smem:[#allocation12_spill]] %s5000_s29 }
  0x14   :  { %5729 = sst [smem:[#allocation13_spill]] %s5005_s3 }
  0x15   :  { %5730 = sst [smem:[#allocation14_spill]] %s5010_s8 }
  0x16   :  { %5731 = sst [smem:[#allocation15_spill]] %s5015_s14 }
  0x17   :  { %5732 = sst [smem:[#allocation16_spill]] %s5020_s19 }
  0x18   :  { %5733 = sst [smem:[#allocation17_spill]] %s5025_s24 }
  0x19   :  { %s5030_s30 = sld [smem:[%s5695_s0 + %s4936_s26]]  }
  0x1a   :  { %s5035_s6 = sld [smem:[%s5695_s0 + %s4937_s1]]  }
  0x1b   :  { %s5040_s12 = sld [smem:[%s5695_s0 + %s4938_s7]]   ;;  %s4942_s7 = smov 18  }
  0x1c   :  { %s5045_s20 = sld [smem:[%s5695_s0 + %s4939_s15]]   ;;  %s4943_s15 = smov 19  }
  0x1d   :  { %s5050_s27 = sld [smem:[%s5695_s0 + %s4940_s22]]   ;;  %s4944_s22 = smov 20  }
  0x1e   :  { %s5055_s4 = sld [smem:[%s5695_s0 + %s4941_s28]]   ;;  %s4945_s28 = smov 21  }
  0x1f   :  { %5734 = sst [smem:[#allocation18_spill]] %s5030_s30 }
  0x20   :  { %5735 = sst [smem:[#allocation19_spill]] %s5035_s6 }
  0x21   :  { %s5060_s9 = sld [smem:[%s5695_s0 + %s4942_s7]]   ;;  %s4946_s7 = smov 22  }
  0x22   :  { %5736 = sst [smem:[#allocation20_spill]] %s5045_s20 }
  0x23   :  { %5737 = sst [smem:[#allocation21_spill]] %s5050_s27 }
  0x24   :  { %5738 = sst [smem:[#allocation22_spill]] %s5055_s4 }
  0x25   :  { %s5065_s20 = sld [smem:[%s5695_s0 + %s4943_s15]]   ;;  %s4947_s15 = smov 23  }
  0x26   :  { %s5070_s27 = sld [smem:[%s5695_s0 + %s4944_s22]]   ;;  %s4948_s22 = smov 24  }
  0x27   :  { %5739 = sst [smem:[#allocation23_spill]] %s5060_s9 }
  0x28   :  { %s5075_s4 = sld [smem:[%s5695_s0 + %s4945_s28]]   ;;  %s4949_s28 = smov 25  }
  0x29   :  { %s5080_s9 = sld [smem:[%s5695_s0 + %s4946_s7]]   ;;  %s4950_s7 = smov 26  }
  0x2b   :  { %5740 = sst [smem:[#allocation24_spill]] %s5065_s20 }
  0x2c   :  { %5741 = sst [smem:[#allocation25_spill]] %s5070_s27 }
  0x2d   :  { %s5085_s20 = sld [smem:[%s5695_s0 + %s4947_s15]]   ;;  %s4951_s15 = smov 27  }
  0x2e   :  { %5742 = sst [smem:[#allocation26_spill]] %s5075_s4 }
  0x2f   :  { %5743 = sst [smem:[#allocation27_spill]] %s5080_s9 }
  0x30   :  { %s5090_s27 = sld [smem:[%s5695_s0 + %s4948_s22]]   ;;  %s4952_s22 = smov 28  }
  0x31   :  { %s5095_s4 = sld [smem:[%s5695_s0 + %s4949_s28]]   ;;  %s4953_s28 = smov 29  }
  0x32   :  { %s5100_s9 = sld [smem:[%s5695_s0 + %s4950_s7]]   ;;  %s4954_s7 = smov 30  }
  0x33   :  { %5744 = sst [smem:[#allocation28_spill]] %s5085_s20 }
  0x34   :  { %s5105_s20 = sld [smem:[%s5695_s0 + %s4951_s15]]  }
  0x36   :  { %5745 = sst [smem:[#allocation29_spill]] %s5090_s27 }
  0x37   :  { %5746 = sst [smem:[#allocation30_spill]] %s5095_s4 }
  0x38   :  { %5747 = sst [smem:[#allocation31_spill]] %s5100_s9 }
  0x39   :  { %s5110_s27 = sld [smem:[%s5695_s0 + %s4952_s22]]  }
  0x3a   :  { %5748 = sst [smem:[#allocation32_spill]] %s5105_s20 }
  0x3b   :  { %s5115_s4 = sld [smem:[%s5695_s0 + %s4953_s28]]  }
  0x3c   :  { %s5120_s9 = sld [smem:[%s5695_s0 + %s4954_s7]]  }
  0x3f   :  { %5749 = sst [smem:[#allocation33_spill]] %s5110_s27 }
  0x41   :  { %5750 = sst [smem:[#allocation34_spill]] %s5115_s4 }
  0x42   :  { %5751 = sst [smem:[#allocation35_spill]] %s5120_s9 }
  0x43   :  { %67 = vsyncpa [#allocation4], 0 }
  0x44   :  { %69 = vsyncpa [#allocation4 + $0x1], 0  ;;  %s5122_s15 = smov 0   ;;  %s5124_s16 = smov 0  }
  0x45   :  { %s5126_s18 = smov 0   ;;  %s5128_s22 = smov 0  }
  0x46   :  { %s5130_s23 = smov 0   ;;  %s5132_s26 = smov 0  }
  0x47   :  { %s5134_s28 = smov 0   ;;  %s5136_s1 = smov 0  }
  0x48 LB: > { %5752 = sst [smem:[#allocation36_spill]] %s4895_s15  ;;  %s4161_s0 = sadd.s32 4294967295, %s4923_s1   ;;  %s4923_s1 = sphi %s5136_s1, %s75_s1   ;;  %s4919_s28 = sphi %s5134_s28, %s5856_s28   ;;  %s4915_s26 = sphi %s5132_s26, %s5855_s26   ;;  %s4911_s23 = sphi %s5130_s23, %s5854_s23   ;;  %s4907_s22 = sphi %s5128_s22, %s5853_s22   ;;  %s4903_s18 = sphi %s5126_s18, %s5852_s18   ;;  %s4899_s16 = sphi %s5124_s16, %s5851_s16   ;;  %s4895_s15 = sphi %s5122_s15, %s5850_s15  }
  0x49   : > { %5753 = sst [smem:[#allocation37_spill]] %s4899_s16  ;;  %s4162_s2 = sadd.s32 4294967294, %s4923_s1  }
  0x4a   : > { %5754 = sst [smem:[#allocation38_spill]] %s4903_s18  ;;  %s84_s7 = sadd.s32 1, %s4915_s26 }
  0x4b   : > { %5755 = sst [smem:[#allocation39_spill]] %s4907_s22  ;;  %p85_p0 = scmp.ge.s32.totalorder %s84_s7, 2 }
  0x4c   : > { %5756 = sst [smem:[#allocation40_spill]] %s4911_s23  ;;  %s87_s10 = sadd.s32 1, %s4919_s28 }
  0x4d   : > { %5757 = sst [smem:[#allocation41_spill]] %s4915_s26  ;;  %p869_p1 = scmp.ne.s32.totalorder %s4903_s18, %s4899_s16 }
  0x4e   : > { %5758 = sst [smem:[#allocation42_spill]] %s4919_s28  ;;  %p870_p2 = scmp.eq.s32.totalorder %s4161_s0, 3 }
  0x4f   : > { %5759 = sst [smem:[#allocation43_spill]] %s4923_s1  ;;  %s5858_s7 = smov (%p85_p0, %s84_s7), 0 }
  0x50   : > { %5760 = sst [smem:[#allocation44_spill]] %s5858_s7  ;;  %s5860_s10 = smov (!%p85_p0, %s87_s10), %s4919_s28 }
  0x51   : > { %p5171_p3 = por %p870_p2, %p869_p1  ;;  %p875_p4 = scmp.ne.s32.totalorder %s4899_s16, %s4895_s15 }
  0x52   : > { %p89_p5 = scmp.ge.s32.totalorder %s5860_s10, 2  ;;  %p876_p6 = scmp.eq.s32.totalorder %s4162_s2, 3 }
  0x53   : > { %s5761_s11 = scalar_select %p5171_p3, 1, 0 }
  0x54   : > { %p4165_p7 = scmp.ge.s32.totalorder %s4923_s1, 1  ;;  %p1082_p8 = scmp.lt.s32.totalorder %s4923_s1, 5 }
  0x55   : > { %5762 = sst [smem:[#allocation45_spill]] %s5761_s11  ;;  %s5862_s10 = smov (%p89_p5, %s5860_s10), 0 }
  0x56   : > { %5763 = sst [smem:[#allocation46_spill]] %s5862_s10  ;;  %p5181_p9 = por %p876_p6, %p875_p4 }
  0x57   : > { %p1083_p10 = pnand %p4165_p7, %p1082_p8  ;;  %s856_s0 = ssub.s32 %s4919_s28, %s5862_s10 }
  0x58   : > { %s5764_s26 = scalar_select %p5181_p9, 1, 0 }
  0x59   : > { %s859_s7 = sadd.s32 1, %s4903_s18  ;;  %p857_p11 = scmp.eq.s32.totalorder %s856_s0, 0 }
  0x5a   : > { %5765 = sst [smem:[#allocation47_spill]] %s5764_s26  ;;  %1086 = sbr.rel (%p1083_p10) target bundleno = 4469 (0x1175), region = 136 }
  0x5b   : > { %s5189_s9 = scalar_select %p857_p11, %s4903_s18, %s859_s7  }
  0x5d   : > { %5766 = sst [smem:[#allocation48_spill]] %s5189_s9 }
  0x61   : > { %s5769_s13 = sld [smem:[#allocation8_spill]]  ;;  %s5700_s2 = sand.u32 1, %s4899_s16  }
  0x62   : > { %p1259_p12 = scmp.lt.s32.totalorder %s4911_s23, 1  ;;  %s5195_s10 = sshll.u32 %s5700_s2, 5 }
  0x63   : > { %s5772_s25 = sld [smem:[#allocation11_spill]]  ;;  %s4168_s7 = sshll.u32 %s4911_s23, 4 }
  0x64   : > { %s5773_s29 = sld [smem:[#allocation12_spill]]  ;;  %p1264_p13 = scmp.lt.s32.totalorder %s4168_s7, 31 }
  0x65   : > { %s5199_s0 = scalar_select %p1259_p12, %s4911_s23, 1 }
  0x66   : > { %s5864_s7 = smov (!%p1264_p13, %s4168_s7), 31  ;;  %s5776_s3 = sld [smem:[#allocation13_spill]] }
  0x67   : > { %5774 = sst [smem:[#allocation49_spill]] %s5199_s0  ;;  %s5202_s28 = sshll.u32 %s5199_s0, 3 }
  0x68   : > { %5777 = sst [smem:[#allocation50_spill]] %s5202_s28  ;;  %s5778_s14 = sld [smem:[#allocation15_spill]] }
  0x69   : > { %s5780_s24 = sld [smem:[#allocation17_spill]]  ;;  %s4169_s18 = sshll.u32 %s5864_s7, 3 }
  0x6a   : > { %s5781_s30 = sld [smem:[#allocation18_spill]]  ;;  %s5209_s26 = scalar_lea.vmem %s5769_s13, %s4169_s18 }
  0x6b   : > { %5782 = sst [smem:[#allocation51_spill]] %s5209_s26  ;;  %p1276_p0 = scmp.lt.s32.totalorder %s4907_s22, 1 }
  0x6c   : > { %s5783_s6 = sld [smem:[#allocation19_spill]]  ;;  %s5784_s1 = sld [smem:[#allocation20_spill]] }
  0x6d   : > { %s5785_s16 = sld [smem:[#allocation21_spill]]  ;;  %s5786_s7 = sld [smem:[#allocation22_spill]] }
  0x6e   : > { %s5217_s23 = scalar_select %p1276_p0, %s4907_s22, 1 }
  0x6f   : > { %s5787_s18 = sld [smem:[#allocation23_spill]]  ;;  %s5789_s13 = sld [smem:[#allocation24_spill]] }
  0x70   : > { %s4287_s9 = sshll.u32 %s5217_s23, 6  ;;  %s4173_s2 = sshll.u32 %s5217_s23, 2 }
  0x71   : > { %s5222_s15 = scalar_lea.vmem %s5772_s25, %s4287_s9  ;;  %s5225_s11 = scalar_lea.vmem %s5773_s29, %s4173_s2 }
  0x72   : > { %5788 = sst [smem:[#allocation52_spill]] %s5222_s15  ;;  %s5791_s4 = sld [smem:[#allocation25_spill]] }
  0x73   : > { %5790 = sst [smem:[#allocation53_spill]] %s5225_s11  ;;  %s4288_s27 = sshll.u32 %s5217_s23, 4 }
  0x74   : > { %s5792_s20 = sld [smem:[#allocation26_spill]]  ;;  %s5793_s21 = sld [smem:[#allocation27_spill]] }
  0x75   : > { %s5231_s26 = scalar_lea.vmem %s5776_s3, %s4288_s27  ;;  %s5795_s17 = sld [smem:[#allocation28_spill]] }
  0x76   : > { %5794 = sst [smem:[#allocation54_spill]] %s5231_s26  ;;  %s5234_s28 = scalar_lea.vmem %s5778_s14, %s4288_s27 }
  0x77   : > { %5796 = sst [smem:[#allocation55_spill]] %s5234_s28  ;;  %s5797_s25 = sld [smem:[#allocation29_spill]] }
  0x78   : > { %s5798_s29 = sld [smem:[#allocation30_spill]]  ;;  %s5239_s11 = scalar_lea.vmem %s5780_s24, %s4287_s9 }
  0x79   : > { %5799 = sst [smem:[#allocation56_spill]] %s5239_s11  ;;  %s5800_s5 = sld [smem:[#allocation31_spill]] }
  0x7a   : > { %s5242_s22 = scalar_lea.vmem %s5781_s30, %s4173_s2  ;;  %s5245_s0 = scalar_lea.vmem %s5783_s6, %s4288_s27 }
  0x7b   : > { %5801 = sst [smem:[#allocation57_spill]] %s5242_s22  ;;  %s5250_s8 = scalar_lea.vmem %s5784_s1, %s4288_s27 }
  0x7c   : > { %5802 = sst [smem:[#allocation58_spill]] %s5245_s0  ;;  %s1325_s26 = scalar_lea.vmem %s5785_s16, %s5217_s23 }
  0x7d   : > { %s5255_s14 = scalar_lea.vmem %s5786_s7, %s4288_s27  ;;  %s1333_s28 = scalar_lea.vmem %s5787_s18, %s5217_s23 }
  0x7e   : > { %s4294_s15 = sshll.u32 %s5217_s23, 5  ;;  %s1341_s9 = scalar_lea.vmem %s5791_s4, %s5217_s23 }
  0x7f   : > { %s5261_s19 = scalar_lea.vmem %s5789_s13, %s4294_s15  ;;  %s1344_s24 = scalar_lea.vmem %s5792_s20, %s5217_s23 }
  0x80   : > { %s1347_s11 = scalar_lea.vmem %s5793_s21, %s5217_s23  ;;  %s1350_s2 = scalar_lea.vmem %s5795_s17, %s5217_s23 }
  0x81   : > { %s1353_s30 = scalar_lea.vmem %s5797_s25, %s5217_s23  ;;  %s1356_s22 = scalar_lea.vmem %s5798_s29, %s5217_s23 }
  0x82   : > { %s1359_s6 = scalar_lea.vmem %s5800_s5, %s5217_s23  ;;  %s5278_s0 = scalar_lea.vmem [#allocation3], %s5195_s10 }
  0x83   : > { %s5803_s3 = sld [smem:[#allocation39_spill]] }
  0x89   : > { %p4190_p1 = scmp.ne.s32.totalorder %s5803_s3, 0 }
  0x8a   : > { %s5804_s1 = sld [smem:[#allocation6_spill]] (!%p4190_p1)  ;;  %s5805_s16 = sld [smem:[#allocation50_spill]] (!%p4190_p1)  ;;  %vm1373_vm0 = vcmask (!%p4190_p1), 261120  }
  0x8b   : > { %1368 = sbr.rel (%p4190_p1) target bundleno = 151 (0x97), region = 140  ;;  %s5807_s7 = sld [smem:[#allocation7_spill]] (!%p4190_p1) }
  0x90   : > { %s5806_s27 = scalar_lea.vmem (!%p4190_p1), %s5804_s1, %s5805_s16 }
  0x91   : > { %v1369_v0 = vld [vmem:[%s5806_s27] sm:$0xff] (!%p4190_p1) }
  0x92   : > { %v1371_v1 = vld [vmem:[%s5807_s7] sm:$0xff]  ;;  %v1370_v2 = vmul.f32 5.656854, %v1369_v0 }
  0x94   : > { %v1372_v3 = vadd.f32 %v1371_v1, %v1370_v2 }
  0x96   : > { %1374 = vst.msk [vmem:[#allocation2] sm:$0xff] %vm1373_vm0, %v1372_v3 }
  0x97 PF: > { %s5808_s13 = sld [smem:[#allocation52_spill]]  ;;  %s5809_s5 = sld [smem:[#allocation54_spill]]  ;;  %v4955_v5 = vmov 0.0   ;;  %vm4956_vm1 = vmmov 0   ;;  %vm1461_vm2 = vcmask 261120   ;;  %vm1767_vm3 = vcmask 1043456  }
  0x98   : > { %4408 = vmatprep.subr.bf16.mxu0 %v4955_v5  ;;  %4392 = vmatprep.subr.bf16.mxu1 %v4955_v5  ;;  %s5810_s17 = sld [smem:[#allocation14_spill]]  ;;  %s5812_s25 = sld [smem:[#allocation53_spill]]  ;;  %vm1763_vm4 = vcmask 64512   ;;  %vm3601_vm5 = vcmask 523264  }
  0x99   : > { %4412 = vmatprep.mubr.msk.bf16.mxu0 %vm4956_vm1, %v4955_v5  ;;  %4396 = vmatprep.mubr.msk.bf16.mxu1 %vm4956_vm1, %v4955_v5  ;;  %s5813_s29 = sld [smem:[#allocation9_spill]]  ;;  %s5814_s3 = sld [smem:[#allocation50_spill]] }
  0x9a   : > { %s5816_s4 = sld [smem:[#allocation55_spill]]  ;;  %s5817_s15 = sld [smem:[#allocation16_spill]] }
  0x9b   : > { %s5819_s18 = sld [smem:[#allocation56_spill]]  ;;  %s5822_s27 = sld [smem:[#allocation58_spill]] }
  0x9c   : > { %s5823_s7 = sld [smem:[#allocation51_spill]] }
  0x9d   : > { %v4763_v4 = vld [vmem:[%s5808_s13 + $0x20] sm:$0xff]   ;;  %v4764_v6 = vld [vmem:[%s5808_s13 + $0x28] sm:$0xff]   ;;  %v4769_v13 = vld [vmem:[%s5808_s13 + $0x10] sm:$0xff]  }
  0x9e   : > { %4409 = vmatpush3.bf16.msra.mxu0 %v4763_v4  ;;  %v5291_v7 = vld [vmem:[#allocation2] sm:$0xff]  ;;  %v4768_v11 = vld [vmem:[%s5808_s13 + $0x8] sm:$0xff]   ;;  %v4770_v14 = vld [vmem:[%s5808_s13 + $0x18] sm:$0xff]   ;;  %s5811_s21 = scalar_lea.vmem %s5810_s17, %s5217_s23 }
  0x9f   : > { %4410 = vmatprep.subr.bf16.mxu0 %v4955_v5  ;;  %v1424_v8 = vpack.c.bf16 %v5291_v7, %v5291_v7  ;;  %v4767_v9 = vld [vmem:[%s5808_s13] sm:$0xff]   ;;  %v4766_v12 = vld [vmem:[%s5809_s5 + $0x8] sm:$0xff]   ;;  %v4771_v15 = vld [vmem:[%s5808_s13 + $0x30] sm:$0xff]   ;;  %s5815_s20 = scalar_lea.vmem %s5813_s29, %s5814_s3 }
  0xa0   : > { %v4765_v10 = vld [vmem:[%s5809_s5] sm:$0xff]   ;;  %4393 = vmatpush3.bf16.msra.mxu1 %v4767_v9  ;;  %v4772_v16 = vld [vmem:[%s5808_s13 + $0x38] sm:$0xff]   ;;  %s5818_s10 = scalar_lea.vmem %s5817_s15, %s5217_s23  ;;  %s5826_s13 = sld [smem:[#allocation10_spill]] }
  0xa1   : > { %4394 = vmatprep.subr.bf16.mxu1 %v4955_v5  ;;  %v4207_v22 = vld [vmem:[%s5811_s21] ss:$0 sm:$0xff]  ;;  %v4192_v41 = vld [vmem:[%s5812_s25 + $0x1] ss:$0 sm:$0xff]  ;;  %v4193_v49 = vld [vmem:[%s5812_s25 + $0x2] ss:$0 sm:$0xff] }
  0xa2   : > { %4411 = vmatpush3.bf16.msra.mxu0 %v4764_v6  ;;  %v4191_v39 = vld [vmem:[%s5812_s25] ss:$0 sm:$0xff]  ;;  %v4194_v53 = vld [vmem:[%s5812_s25 + $0x3] ss:$0 sm:$0xff]  ;;  %s5827_s5 = sld [smem:[#allocation49_spill]] }
  0xa3   : > { %4424 = vmatprep.subr.bf16.mxu0 %v4955_v5  ;;  %v1392_v6 = vld [vmem:[%s5815_s20] sm:$0xff] }
  0xa4   : > { %4395 = vmatpush3.bf16.msra.mxu1 %v4768_v11 }
  0xa5   : > { %4413 = vmatmul.mubr.msk.bf16.vlgmr.msra.gmra.mrb[0].mxu0 %vm1461_vm2, %v1424_v8  ;;  %4400 = vmatprep.subr.bf16.mxu1 %v4955_v5 }
  0xa6   : > { %4425 = vmatpush3.bf16.msra.mxu0 %v4765_v10  ;;  %4428 = vmatprep.mubr.msk.bf16.mxu0 %vm4956_vm1, %v4955_v5 }
  0xa7   : > { %4426 = vmatprep.subr.bf16.mxu0 %v4955_v5  ;;  %4397 = vmatmul.mubr.msk.bf16.vlgmr.msra.gmra.mrb[0].mxu1 %vm1461_vm2, %v1424_v8 }
  0xa8   : > { %4401 = vmatpush3.bf16.msra.mxu1 %v4769_v13  ;;  %4404 = vmatprep.mubr.msk.bf16.mxu1 %vm4956_vm1, %v4955_v5  ;;  %s5828_s17 = scalar_lea.vmem %s5826_s13, %s5827_s5 }
  0xa9   : > { %4402 = vmatprep.subr.bf16.mxu1 %v4955_v5 }
  0xaa   : > { %4427 = vmatpush3.bf16.msra.mxu0 %v4766_v12 }
  0xab   : > { %4438 = vmatprep.subr.bf16.mxu0 %v4955_v5 }
  0xac   : > { %4403 = vmatpush3.bf16.msra.mxu1 %v4770_v14 }
  0xad   : > { %4429 = vmatmul.mubr.msk.bf16.vlgmr.msra.gmra.mrb[4].mxu0 %vm1461_vm2, %v1424_v8  ;;  %4416 = vmatprep.subr.bf16.mxu1 %v4955_v5 }
  0xae   : > { %4440 = vmatprep.mubr.msk.bf16.mxu0 %vm4956_vm1, %v4955_v5 }
  0xaf   : > { %4405 = vmatmul.mubr.msk.bf16.vlgmr.msra.gmra.mrb[4].mxu1 %vm1461_vm2, %v1424_v8 }
  0xb0   : > { %4417 = vmatpush3.bf16.msra.mxu1 %v4771_v15  ;;  %4420 = vmatprep.mubr.msk.bf16.mxu1 %vm4956_vm1, %v4955_v5 }
  0xb1   : > { %4418 = vmatprep.subr.bf16.mxu1 %v4955_v5 }
  0xb4   : > { %4419 = vmatpush3.bf16.msra.mxu1 %v4772_v16 }
  0xb5   : > { %4432 = vmatprep.subr.bf16.mxu1 %v4955_v5 }
  0xb7   : > { %4421 = vmatmul.mubr.msk.bf16.vlgmr.msra.gmra.mrb[8].mxu1 %vm1461_vm2, %v1424_v8 }
  0xb8   : > { %4434 = vmatprep.mubr.msk.bf16.mxu1 %vm4956_vm1, %v4955_v5 }
 0x178   : > { %v1603_v17 = vpop.f32.mrb[0].mxu0 }
 0x179   : > { %v4414_v18 = vpop.f32.mrb[1].mxu0  ;;  %v1604_v54 = vadd.f32 %v4193_v49, %v1603_v17 }
 0x17a   : > { %v1606_v19 = vpop.f32.mrb[2].mxu0  ;;  %v1499_v21 = vpop.f32.mrb[0].mxu1 }
 0x17b   : > { %v4415_v20 = vpop.f32.mrb[3].mxu0  ;;  %v4398_v23 = vpop.f32.mrb[1].mxu1  ;;  %v1500_v42 = vadd.f32 %v4191_v39, %v1499_v21  ;;  %v1761_v59 = vpack.c.bf16 %v1604_v54, %v1604_v54 }
 0x17c   : > { %v1502_v24 = vpop.f32.mrb[2].mxu1 }
 0x17d   : > { %v4399_v26 = vpop.f32.mrb[3].mxu1  ;;  %v1759_v47 = vpack.c.bf16 %v1500_v42, %v1500_v42 }
 0x180   : > { %v1713_v25 = vpop.f32.mrb[4].mxu0 }
 0x181   : > { %v4430_v27 = vpop.f32.mrb[5].mxu0  ;;  %v1714_v28 = vadd.f32 %v4207_v22, %v1713_v25 }
 0x182   : > { %v1716_v29 = vpop.f32.mrb[6].mxu0  ;;  %v1551_v31 = vpop.f32.mrb[4].mxu1 }
 0x183   : > { %1719 = vxpose.xlu0.b32.start.end [1/1] (short) (narrow) %v1714_v28, 64  ;;  %v4431_v30 = vpop.f32.mrb[7].mxu0  ;;  %v4406_v32 = vpop.f32.mrb[5].mxu1  ;;  %v1552_v45 = vadd.f32 %v4192_v41, %v1551_v31 }
 0x184   : > { %v1554_v33 = vpop.f32.mrb[6].mxu1 }
 0x185   : > { %v4407_v34 = vpop.f32.mrb[7].mxu1  ;;  %v1760_v50 = vpack.c.bf16 %v1552_v45, %v1552_v45 }
 0x18a   : > { %v1655_v35 = vpop.f32.mrb[8].mxu1 }
 0x18b   : > { %v4422_v36 = vpop.f32.mrb[9].mxu1  ;;  %v1656_v57 = vadd.f32 %v4194_v53, %v1655_v35 }
 0x18c   : > { %v1658_v37 = vpop.f32.mrb[10].mxu1 }
 0x18d   : > { %v4423_v38 = vpop.f32.mrb[11].mxu1  ;;  %v1762_v61 = vpack.c.bf16 %v1656_v57, %v1656_v57 }
 0x203   : > { %v1735_v40 = vpop.trf.xlu0 }
 0x204   : > { %v1751_v43 = vpack.c.bf16 %v1735_v40, %v1735_v40 }
 0x206   : > { %v1769_v44 = vsel %vm1767_vm3, %v1751_v43, 0 }
 0x207   : > { %v1736_v46 = vpop.trf.xlu0  ;;  %4433 = vmatpush3.bf16.msra.mxu1 %v1769_v44 }
 0x208   : > { %v1752_v48 = vpack.c.bf16 %v1736_v46, %v1736_v46  ;;  %4444 = vmatprep.subr.bf16.mxu1 %v4955_v5 }
 0x20a   : > { %v1815_v51 = vsel %vm1767_vm3, %v1752_v48, 0  ;;  %4435 = vmatmul.mubr.msk.bf16.vlgmr.msra.gmra.mrb[12].mxu1 %vm1763_vm4, %v1759_v47 }
 0x20b   : > { %4439 = vmatpush3.bf16.msra.mxu0 %v1815_v51  ;;  %v1737_v52 = vpop.trf.xlu0  ;;  %4446 = vmatprep.mubr.msk.bf16.mxu1 %vm4956_vm1, %v4955_v5 }
 0x20c   : > { %v1753_v55 = vpack.c.bf16 %v1737_v52, %v1737_v52  ;;  %4450 = vmatprep.subr.bf16.mxu0 %v4955_v5 }
 0x20e   : > { %v1861_v56 = vsel %vm1767_vm3, %v1753_v55, 0  ;;  %4441 = vmatmul.mubr.msk.bf16.vlgmr.msra.gmra.mrb[8].mxu0 %vm1763_vm4, %v1760_v50 }
 0x20f   : > { %v1738_v58 = vpop.trf.xlu0  ;;  %4445 = vmatpush3.bf16.msra.mxu1 %v1861_v56  ;;  %4452 = vmatprep.mubr.msk.bf16.mxu0 %vm4956_vm1, %v4955_v5 }
 0x210   : > { %v1754_v60 = vpack.c.bf16 %v1738_v58, %v1738_v58  ;;  %4456 = vmatprep.subr.bf16.mxu1 %v4955_v5 }
 0x212   : > { %v1907_v62 = vsel %vm1767_vm3, %v1754_v60, 0  ;;  %4447 = vmatmul.mubr.msk.bf16.vlgmr.msra.gmra.mrb[16].mxu1 %vm1763_vm4, %v1761_v59 }
 0x213   : > { %4451 = vmatpush3.bf16.msra.mxu0 %v1907_v62  ;;  %4458 = vmatprep.mubr.msk.bf16.mxu1 %vm4956_vm1, %v4955_v5  ;;  %v1739_v63 = vpop.trf.xlu0 }
 0x214   : > { %4462 = vmatprep.subr.bf16.mxu0 %v4955_v5  ;;  %v1755_v0 = vpack.c.bf16 %v1739_v63, %v1739_v63 }
 0x216   : > { %4453 = vmatmul.mubr.msk.bf16.vlgmr.msra.gmra.mrb[12].mxu0 %vm1763_vm4, %v1762_v61  ;;  %v2001_v1 = vsel %vm1763_vm4, %v1755_v0, 0 }
 0x217   : > { %4464 = vmatprep.mubr.msk.bf16.mxu0 %vm4956_vm1, %v4955_v5  ;;  %v1740_v2 = vpop.trf.xlu0 }
 0x218   : > { %4457 = vmatpush3.bf16.xpose.msra.mxu1 %v2001_v1  ;;  %v1756_v3 = vpack.c.bf16 %v1740_v2, %v1740_v2 }
 0x219   : > { %4468 = vmatprep.subr.bf16.mxu1 %v4955_v5 }
 0x21a   : > { %v2047_v4 = vsel %vm1763_vm4, %v1756_v3, 0 }
 0x21b   : > { %v1741_v32 = vpop.trf.xlu0 }
 0x21c   : > { %4463 = vmatpush3.bf16.xpose.msra.mxu0 %v2047_v4  ;;  %v1757_v58 = vpack.c.bf16 %v1741_v32, %v1741_v32 }
 0x21d   : > { %4474 = vmatprep.subr.bf16.mxu0 %v4955_v5 }
 0x21e   : > { %v2093_v63 = vsel %vm1763_vm4, %v1757_v58, 0  ;;  %v4223_v58 = vld [vmem:[%s5818_s10] ss:$0 sm:$0xff] }
 0x21f   : > { %v1742_v33 = vpop.trf.xlu0 }
 0x220   : > { %v1758_v0 = vpack.c.bf16 %v1742_v33, %v1742_v33 }
 0x222   : > { %v2139_v4 = vsel %vm1763_vm4, %v1758_v0, 0 }
 0x2dd   : > { %v1805_v8 = vpop.f32.mrb[12].mxu1 }
 0x2de   : > { %v1806_v9 = vadd.f32 %v1805_v8, %v1392_v6  ;;  %v4436_v10 = vpop.f32.mrb[13].mxu1 }
 0x2df   : > { %v1808_v11 = vpop.f32.mrb[14].mxu1 }
 0x2e0   : > { %v4437_v12 = vpop.f32.mrb[15].mxu1  ;;  %v1949_v13 = vsel %vm1763_vm4, %v1806_v9, -inf }
 0x2e1   : > { %v1851_v14 = vpop.f32.mrb[8].mxu0  ;;  %1950 = vmax.xlane.f32.xlu0 %v1949_v13  ;;  %v1419_v12 = vld [vmem:[%s5816_s4] sm:$0xf] }
 0x2e2   : > { %v1852_v15 = vadd.f32 %v1851_v14, %v1392_v6  ;;  %v4442_v16 = vpop.f32.mrb[9].mxu0  ;;  %v2189_v13 = vsel %vm1767_vm3, %v1419_v12, 0  ;;  %v1420_v14 = vld [vmem:[%s5816_s4 + $0x4] sm:$0xf]  ;;  %v4775_v12 = vld [vmem:[%s5819_s18 + $0x8] sm:$0xff]  }
 0x2e3   : > { %v1854_v17 = vpop.f32.mrb[10].mxu0  ;;  %v1421_v16 = vld [vmem:[%s5816_s4 + $0x8] sm:$0xf] }
 0x2e4   : > { %v4443_v18 = vpop.f32.mrb[11].mxu0  ;;  %v1952_v19 = vsel %vm1763_vm4, %v1852_v15, -inf }
 0x2e5   : > { %1953 = vmax.xlane.f32.xlu1 %v1952_v19  ;;  %v1897_v20 = vpop.f32.mrb[16].mxu1 }
 0x2e6   : > { %v1898_v21 = vadd.f32 %v1897_v20, %v1392_v6  ;;  %v4448_v22 = vpop.f32.mrb[17].mxu1  ;;  %v2281_v20 = vsel %vm1767_vm3, %v1421_v16, 0 }
 0x2e7   : > { %v1900_v23 = vpop.f32.mrb[18].mxu1  ;;  %v1422_v22 = vld [vmem:[%s5816_s4 + $0xc] sm:$0xf] }
 0x2e8   : > { %v4449_v24 = vpop.f32.mrb[19].mxu1  ;;  %v1955_v25 = vsel %vm1763_vm4, %v1898_v21, -inf }
 0x2e9   : > { %v1943_v26 = vpop.f32.mrb[12].mxu0  ;;  %1956 = vmax.xlane.f32.xlu1 %v1955_v25 }
 0x2ea   : > { %v1944_v27 = vadd.f32 %v1943_v26, %v1392_v6  ;;  %v4454_v28 = vpop.f32.mrb[13].mxu0 }
 0x2eb   : > { %v1946_v29 = vpop.f32.mrb[14].mxu0 }
 0x2ec   : > { %v4455_v30 = vpop.f32.mrb[15].mxu0  ;;  %v1958_v31 = vsel %vm1763_vm4, %v1944_v27, -inf }
 0x2ed   : > { %1959 = vmax.xlane.f32.xlu1 %v1958_v31 }
 0x36e   : > { %v1951_v34 = vpop.xlane.xlu0 %1950 }
 0x36f   : > { %v1961_v35 = vsub.f32 %v1806_v9, %v1951_v34 }
 0x371   : > { %v1965_v36 = vmul.f32 1.442695, %v1961_v35 }
 0x372   : > { %v1954_v37 = vpop.xlane.xlu1 %1953 }
 0x373   : > { %4789 = vpow2.f32 %v1965_v36  ;;  %v1962_v38 = vsub.f32 %v1852_v15, %v1954_v37  ;;  %v2235_v15 = vsel %vm1767_vm3, %v1420_v14, 0 }
 0x375   : > { %v1967_v39 = vmul.f32 1.442695, %v1962_v38 }
 0x376   : > { %v1957_v40 = vpop.xlane.xlu1 %1956 }
 0x377   : > { %4791 = vpow2.f32 %v1967_v39  ;;  %v1963_v41 = vsub.f32 %v1898_v21, %v1957_v40 }
 0x379   : > { %v1969_v42 = vmul.f32 1.442695, %v1963_v41 }
 0x37a   : > { %v1960_v43 = vpop.xlane.xlu1 %1959 }
 0x37b   : > { %4793 = vpow2.f32 %v1969_v42  ;;  %v1964_v44 = vsub.f32 %v1944_v27, %v1960_v43  ;;  %v2327_v27 = vsel %vm1767_vm3, %v1422_v22, 0  ;;  %v4777_v22 = vld [vmem:[%s5819_s18 + $0x20] sm:$0xff]  }
 0x37d   : > { %v4790_v45 = vpop.eup %4789  ;;  %v1971_v46 = vmul.f32 1.442695, %v1964_v44 }
 0x37e   : > { %v1973_v47 = vsel %vm1763_vm4, %v4790_v45, 0.0 }
 0x37f   : > { %4795 = vpow2.f32 %v1971_v46  ;;  %1974 = vadd.xlane.f32.xlu1 %v1973_v47 }
 0x381   : > { %v4792_v48 = vpop.eup %4791 }
 0x382   : > { %v1976_v49 = vsel %vm1763_vm4, %v4792_v48, 0.0 }
 0x383   : > { %1977 = vadd.xlane.f32.xlu1 %v1976_v49 }
 0x385   : > { %v4794_v50 = vpop.eup %4793 }
 0x386   : > { %v1979_v51 = vsel %vm1763_vm4, %v4794_v50, 0.0 }
 0x387   : > { %1980 = vadd.xlane.f32.xlu1 %v1979_v51 }
 0x389   : > { %v4796_v52 = vpop.eup %4795 }
 0x38a   : > { %v1982_v53 = vsel %vm1763_vm4, %v4796_v52, 0.0 }
 0x38b   : > { %1983 = vadd.xlane.f32.xlu1 %v1982_v53 }
 0x40c   : > { %v1975_v54 = vpop.xlane.xlu1 %1974 }
 0x40d   : > { %4797 = vrcp.f32 %v1975_v54 }
 0x410   : > { %v1978_v55 = vpop.xlane.xlu1 %1977 }
 0x411   : > { %4799 = vrcp.f32 %v1978_v55 }
 0x414   : > { %v1981_v56 = vpop.xlane.xlu1 %1980 }
 0x415   : > { %4801 = vrcp.f32 %v1981_v56 }
 0x417   : > { %v4798_v57 = vpop.eup %4797 }
 0x418   : > { %v1989_v59 = vmul.f32 %v4798_v57, %v4790_v45  ;;  %v1984_v60 = vpop.xlane.xlu1 %1983 }
 0x419   : > { %4803 = vrcp.f32 %v1984_v60 }
 0x41a   : > { %v1993_v61 = vpack.c.bf16 %v1989_v59, %v1989_v59 }
 0x41b   : > { %v4800_v62 = vpop.eup %4799 }
 0x41c   : > { %v1990_v1 = vmul.f32 %v4800_v62, %v4792_v48  ;;  %4459 = vmatmul.mubr.msk.bf16.vlgmr.msra.gmra.mrb[20].mxu1 %vm1763_vm4, %v1993_v61 }
 0x41d   : > { %4469 = vmatpush3.bf16.xpose.msra.mxu1 %v2093_v63  ;;  %4470 = vmatprep.mubr.msk.bf16.mxu1 %vm4956_vm1, %v4955_v5 }
 0x41e   : > { %v1994_v2 = vpack.c.bf16 %v1990_v1, %v1990_v1  ;;  %4480 = vmatprep.subr.bf16.mxu1 %v4955_v5 }
 0x41f   : > { %v4802_v3 = vpop.eup %4801 }
 0x420   : > { %v1991_v6 = vmul.f32 %v4802_v3, %v4794_v50  ;;  %4465 = vmatmul.mubr.msk.bf16.vlgmr.msra.gmra.mrb[16].mxu0 %vm1763_vm4, %v1994_v2 }
 0x421   : > { %4475 = vmatpush3.bf16.xpose.msra.mxu0 %v2139_v4  ;;  %4476 = vmatprep.mubr.msk.bf16.mxu0 %vm4956_vm1, %v4955_v5 }
 0x422   : > { %v1995_v8 = vpack.c.bf16 %v1991_v6, %v1991_v6  ;;  %4486 = vmatprep.subr.bf16.mxu0 %v4955_v5 }
 0x423   : > { %v4804_v9 = vpop.eup %4803 }
 0x424   : > { %v1992_v10 = vmul.f32 %v4804_v9, %v4796_v52  ;;  %4471 = vmatmul.mubr.msk.bf16.vlgmr.msra.gmra.mrb[24].mxu1 %vm1763_vm4, %v1995_v8 }
 0x425   : > { %4482 = vmatprep.mubr.msk.bf16.mxu1 %vm4956_vm1, %v4955_v5  ;;  %4481 = vmatpush3.bf16.msra.mxu1 %v2189_v13 }
 0x426   : > { %v1996_v11 = vpack.c.bf16 %v1992_v10, %v1992_v10  ;;  %4492 = vmatprep.subr.bf16.mxu1 %v4955_v5  ;;  %v4773_v10 = vld [vmem:[%s5819_s18] sm:$0xff]  }
 0x428   : > { %4477 = vmatmul.mubr.msk.bf16.vlgmr.msra.gmra.mrb[20].mxu0 %vm1763_vm4, %v1996_v11  ;;  %v4774_v11 = vld [vmem:[%s5819_s18 + $0x10] sm:$0xff]  }
 0x429   : > { %4488 = vmatprep.mubr.msk.bf16.mxu0 %vm4956_vm1, %v4955_v5  ;;  %4487 = vmatpush3.bf16.msra.mxu0 %v2235_v15 }
 0x42a   : > { %4498 = vmatprep.subr.bf16.mxu0 %v4955_v5 }
 0x4ef   : > { %v2037_v17 = vpop.f32.mrb[20].mxu1 }
 0x4f0   : > { %v2181_v18 = vpack.c.bf16 %v2037_v17, %v2037_v17  ;;  %v4460_v19 = vpop.f32.mrb[21].mxu1  ;;  %v4224_v17 = vld [vmem:[%s1344_s24] ss:$0 sm:$0xff]  ;;  %s5824_s24 = scalar_lea.vmem %s5040_s12, %s5217_s23 }
 0x4f1   : > { %v2040_v21 = vpop.f32.mrb[22].mxu1  ;;  %v4225_v19 = vld [vmem:[%s1347_s11] ss:$0 sm:$0xff]  ;;  %s5825_s11 = sld [smem:[#allocation57_spill]] }
 0x4f2   : > { %v4461_v23 = vpop.f32.mrb[23].mxu1  ;;  %4483 = vmatmul.mubr.msk.bf16.vlgmr.msra.gmra.mrb[28].mxu1 %vm1763_vm4, %v2181_v18 }
 0x4f3   : > { %v2083_v24 = vpop.f32.mrb[16].mxu0  ;;  %4493 = vmatpush3.bf16.msra.mxu1 %v2281_v20  ;;  %4494 = vmatprep.mubr.msk.bf16.mxu1 %vm4956_vm1, %v4955_v5  ;;  %v4778_v23 = vld [vmem:[%s5819_s18 + $0x30] sm:$0xff]  }
 0x4f4   : > { %v2182_v25 = vpack.c.bf16 %v2083_v24, %v2083_v24  ;;  %v4466_v26 = vpop.f32.mrb[17].mxu0  ;;  %4504 = vmatprep.subr.bf16.mxu1 %v4955_v5 }
 0x4f5   : > { %v2086_v28 = vpop.f32.mrb[18].mxu0  ;;  %v4780_v26 = vld [vmem:[%s5819_s18 + $0x38] sm:$0xff]  }
 0x4f6   : > { %v4467_v29 = vpop.f32.mrb[19].mxu0  ;;  %4489 = vmatmul.mubr.msk.bf16.vlgmr.msra.gmra.mrb[24].mxu0 %vm1763_vm4, %v2182_v25  ;;  %v4779_v25 = vld [vmem:[%s5819_s18 + $0x28] sm:$0xff]   ;;  %v1376_v28 = vld [vmem:[%s5823_s7] sm:$0xff] }
 0x4f7   : > { %v2129_v30 = vpop.f32.mrb[24].mxu1  ;;  %4499 = vmatpush3.bf16.msra.mxu0 %v2327_v27  ;;  %4500 = vmatprep.mubr.msk.bf16.mxu0 %vm4956_vm1, %v4955_v5  ;;  %v4781_v27 = vld [vmem:[%s5822_s27] sm:$0xff]   ;;  %v1377_v29 = vld [vmem:[%s5823_s7 + $0x8] sm:$0xff] }
 0x4f8   : > { %v2183_v31 = vpack.c.bf16 %v2129_v30, %v2129_v30  ;;  %v4472_v32 = vpop.f32.mrb[25].mxu1  ;;  %4512 = vmatprep.subr.bf16.mxu0 %v4955_v5  ;;  %v2680_v30 = vpack.c.bf16 %v1377_v29, %v1376_v28 }
 0x4f9   : > { %v2132_v33 = vpop.f32.mrb[26].mxu1  ;;  %v1378_v32 = vld [vmem:[%s5823_s7 + $0x10] sm:$0xff] }
 0x4fa   : > { %v4473_v34 = vpop.f32.mrb[27].mxu1  ;;  %4495 = vmatmul.mubr.msk.bf16.vlgmr.msra.gmra.mrb[32].mxu1 %vm1763_vm4, %v2183_v31  ;;  %v4782_v31 = vld [vmem:[%s5822_s27 + $0x8] sm:$0xff]   ;;  %v1379_v33 = vld [vmem:[%s5823_s7 + $0x18] sm:$0xff] }
 0x4fb   : > { %v2175_v35 = vpop.f32.mrb[20].mxu0  ;;  %4508 = vmatprep.mubr.msk.bf16.mxu1 %vm4956_vm1, %v4955_v5  ;;  %4505 = vmatpush3.bf16.msra.mxu1 %v4773_v10  ;;  %v1380_v34 = vld [vmem:[%s5823_s7 + $0x20] sm:$0xff] }
 0x4fc   : > { %v2184_v36 = vpack.c.bf16 %v2175_v35, %v2175_v35  ;;  %v4478_v37 = vpop.f32.mrb[21].mxu0  ;;  %4506 = vmatprep.subr.bf16.mxu1 %v4955_v5  ;;  %v1381_v35 = vld [vmem:[%s5823_s7 + $0x28] sm:$0xff] }
 0x4fd   : > { %v2178_v38 = vpop.f32.mrb[22].mxu0  ;;  %v2682_v37 = vpack.c.bf16 %v1381_v35, %v1380_v34 }
 0x4fe   : > { %v4479_v39 = vpop.f32.mrb[23].mxu0  ;;  %4501 = vmatmul.mubr.msk.bf16.vlgmr.msra.gmra.mrb[28].mxu0 %vm1763_vm4, %v2184_v36  ;;  %v2681_v36 = vpack.c.bf16 %v1379_v33, %v1378_v32  ;;  %v1382_v38 = vld [vmem:[%s5823_s7 + $0x30] sm:$0xff] }
 0x4ff   : > { %4516 = vmatprep.mubr.msk.bf16.mxu0 %vm4956_vm1, %v4955_v5  ;;  %4513 = vmatpush3.bf16.msra.mxu0 %v4774_v11  ;;  %v1383_v39 = vld [vmem:[%s5823_s7 + $0x38] sm:$0xff] }
 0x500   : > { %4514 = vmatprep.subr.bf16.mxu0 %v4955_v5  ;;  %4507 = vmatpush3.bf16.msra.mxu1 %v4775_v12 }
 0x501   : > { %4520 = vmatprep.subr.bf16.mxu1 %v4955_v5 }
 0x5c5   : > { %v2225_v40 = vpop.f32.mrb[28].mxu1 }
 0x5c6   : > { %v4484_v41 = vpop.f32.mrb[29].mxu1  ;;  %v2369_v45 = vsel %vm1461_vm2, %v2225_v40, 0.0  ;;  %v1384_v40 = vld [vmem:[%s5823_s7 + $0x40] sm:$0xff] }
 0x5c7   : > { %v2228_v42 = vpop.f32.mrb[30].mxu1  ;;  %v1385_v41 = vld [vmem:[%s5823_s7 + $0x48] sm:$0xff] }
 0x5c8   : > { %v4485_v43 = vpop.f32.mrb[31].mxu1  ;;  %v2683_v42 = vpack.c.bf16 %v1383_v39, %v1382_v38 }
 0x5c9   : > { %v2271_v44 = vpop.f32.mrb[24].mxu0  ;;  %v2684_v43 = vpack.c.bf16 %v1385_v41, %v1384_v40  ;;  %v4226_v40 = vld [vmem:[%s5825_s11] ss:$0 sm:$0xff] }
 0x5ca   : > { %v2370_v46 = vsel %vm1461_vm2, %v2271_v44, 0.0  ;;  %v4490_v47 = vpop.f32.mrb[25].mxu0  ;;  %v1386_v44 = vld [vmem:[%s5823_s7 + $0x50] sm:$0xff] }
 0x5cb   : > { %v2371_v48 = vadd.f32 %v2370_v46, %v2369_v45  ;;  %v2274_v49 = vpop.f32.mrb[26].mxu0  ;;  %v1387_v45 = vld [vmem:[%s5823_s7 + $0x58] sm:$0xff]  ;;  %v1388_v46 = vld [vmem:[%s5823_s7 + $0x60] sm:$0xff]  ;;  %v1389_v47 = vld [vmem:[%s5823_s7 + $0x68] sm:$0xff] }
 0x5cc   : > { %v4491_v50 = vpop.f32.mrb[27].mxu0  ;;  %v2686_v49 = vpack.c.bf16 %v1389_v47, %v1388_v46 }
 0x5cd   : > { %v2317_v51 = vpop.f32.mrb[32].mxu1  ;;  %v1390_v50 = vld [vmem:[%s5823_s7 + $0x70] sm:$0xff] }
 0x5ce   : > { %v2372_v52 = vsel %vm1461_vm2, %v2317_v51, 0.0  ;;  %v4496_v53 = vpop.f32.mrb[33].mxu1  ;;  %v1391_v51 = vld [vmem:[%s5823_s7 + $0x78] sm:$0xff] }
 0x5cf   : > { %v2373_v54 = vadd.f32 %v2372_v52, %v2371_v48  ;;  %v2320_v55 = vpop.f32.mrb[34].mxu1  ;;  %v2685_v48 = vpack.c.bf16 %v1387_v45, %v1386_v44  ;;  %v2687_v52 = vpack.c.bf16 %v1391_v51, %v1390_v50 }
 0x5d0   : > { %v4497_v56 = vpop.f32.mrb[35].mxu1 }
 0x5d1   : > { %v2363_v57 = vpop.f32.mrb[28].mxu0 }
 0x5d2   : > { %v2374_v59 = vsel %vm1461_vm2, %v2363_v57, 0.0  ;;  %v4502_v60 = vpop.f32.mrb[29].mxu0 }
 0x5d3   : > { %v2375_v61 = vadd.f32 %v2374_v59, %v2373_v54  ;;  %v2366_v62 = vpop.f32.mrb[30].mxu0 }
 0x5d4   : > { %v4503_v63 = vpop.f32.mrb[31].mxu0 }
 0x5d5   : > { %v2382_v0 = vadd.f32 %v4223_v58, %v2375_v61 }
 0x5d7   : > { %v2383_v1 = vadd.f32 %v2382_v0, %v5291_v7  ;;  %v4776_v7 = vld [vmem:[%s5819_s18 + $0x18] sm:$0xff]  }
 0x5d8   : > { %4515 = vmatpush3.bf16.msra.mxu0 %v4776_v7 }
 0x5d9   : > { %v2386_v2 = vsel %vm1461_vm2, %v2383_v1, 0.0  ;;  %4528 = vmatprep.subr.bf16.mxu0 %v4955_v5 }
 0x5da   : > { %2387 = vadd.xlane.f32.xlu1 %v2386_v2 }
 0x667   : > { %v2388_v3 = vpop.xlane.xlu1 %2387 }
 0x668   : > { %v2390_v4 = vmul.f32 0.03125, %v2388_v3 }
 0x66a   : > { %v2391_v6 = vsub.f32 %v2383_v1, %v2390_v4 }
 0x66c   : > { %v2392_v8 = vmul.f32 %v2391_v6, %v2391_v6 }
 0x66e   : > { %v2393_v9 = vsel %vm1461_vm2, %v2392_v8, 0.0 }
 0x66f   : > { %2394 = vadd.xlane.f32.xlu1 %v2393_v9 }
 0x6fc   : > { %v2395_v13 = vpop.xlane.xlu1 %2394 }
 0x6fd   : > { %v2396_v14 = vmul.f32 0.03125, %v2395_v13 }
 0x6ff   : > { %v2397_v15 = vadd.f32 1e-05, %v2396_v14 }
 0x701   : > { %4805 = vrsqrt.f32 %v2397_v15 }
 0x70b   : > { %v4806_v16 = vpop.eup %4805 }
 0x70c   : > { %v2399_v18 = vmul.f32 %v4806_v16, %v2391_v6  ;;  %v4242_v6 = vld [vmem:[%s5824_s24] ss:$0 sm:$0xff] }
 0x70e   : > { %v2406_v20 = vmul.f32 %v4224_v17, %v2399_v18 }
 0x710   : > { %v5436_v21 = vadd.f32 %v4225_v19, %v2406_v20 }
 0x712   : > { %v2444_v24 = vpack.c.bf16 %v5436_v21, %v5436_v21 }
 0x714   : > { %4509 = vmatmul.mubr.msk.bf16.vlgmr.msra.gmra.mrb[36].mxu1 %vm1461_vm2, %v2444_v24  ;;  %4517 = vmatmul.mubr.msk.bf16.vlgmr.msra.gmra.mrb[32].mxu0 %vm1461_vm2, %v2444_v24 }
 0x715   : > { %4521 = vmatpush3.bf16.msra.mxu1 %v4777_v22  ;;  %4529 = vmatpush3.bf16.msra.mxu0 %v4778_v23 }
 0x716   : > { %4522 = vmatprep.subr.bf16.mxu1 %v4955_v5  ;;  %4530 = vmatprep.subr.bf16.mxu0 %v4955_v5 }
 0x717   : > { %4524 = vmatprep.mubr.msk.bf16.mxu1 %vm4956_vm1, %v4955_v5  ;;  %4532 = vmatprep.mubr.msk.bf16.mxu0 %vm4956_vm1, %v4955_v5 }
 0x719   : > { %4523 = vmatpush3.bf16.msra.mxu1 %v4779_v25  ;;  %4531 = vmatpush3.bf16.msra.mxu0 %v4780_v26 }
 0x71a   : > { %4536 = vmatprep.subr.bf16.mxu1 %v4781_v27  ;;  %4556 = vmatprep.subr.bf16.mxu0 %v4955_v5 }
 0x71c   : > { %4525 = vmatmul.mubr.msk.bf16.vlgmr.msra.gmra.mrb[40].mxu1 %vm1461_vm2, %v2444_v24  ;;  %4533 = vmatmul.mubr.msk.bf16.vlgmr.msra.gmra.mrb[36].mxu0 %vm1461_vm2, %v2444_v24 }
 0x71d   : > { %4537 = vmatpush3.bf16.msra.mxu1 %v4781_v27  ;;  %4540 = vmatprep.mubr.msk.bf16.mxu1 %vm1461_vm2, %v2680_v30 }
 0x71e   : > { %4538 = vmatprep.subr.bf16.mxu1 %v4782_v31  ;;  %4558 = vmatprep.mubr.msk.bf16.mxu0 %vm4956_vm1, %v4955_v5 }
 0x721   : > { %4539 = vmatpush3.bf16.msra.mxu1 %v4782_v31 }
 0x722   : > { %4580 = vmatprep.subr.bf16.mxu1 %v4955_v5 }
 0x724   : > { %4541 = vmatmul.mubr.msk.bf16.vlgmr.msra.gmra.mrb[44].mxu1 %vm1461_vm2, %v2681_v36 }
 0x725   : > { %4544 = vmatprep.mubr.msk.bf16.mxu1 %vm1461_vm2, %v2682_v37 }
 0x72c   : > { %4545 = vmatmul.mubr.msk.bf16.gmra.mrb[48].mxu1 %vm1461_vm2, %v2683_v42 }
 0x72d   : > { %4548 = vmatprep.mubr.msk.bf16.mxu1 %vm1461_vm2, %v2684_v43 }
 0x734   : > { %4549 = vmatmul.mubr.msk.bf16.gmra.mrb[52].mxu1 %vm1461_vm2, %v2685_v48  ;;  %v4227_v48 = vld [vmem:[%s5825_s11 + $0x1] ss:$0 sm:$0xff] }
 0x735   : > { %4552 = vmatprep.mubr.msk.bf16.mxu1 %vm1461_vm2, %v2686_v49 }
 0x73c   : > { %4553 = vmatmul.mubr.msk.bf16.gmra.mrb[56].mxu1 %vm1461_vm2, %v2687_v52 }
 0x73d   : > { %4582 = vmatprep.mubr.msk.bf16.mxu1 %vm4956_vm1, %v4955_v5 }
 0x7e7   : > { %v5486_v53 = vpop.f32.mrb[36].mxu1  ;;  %v5488_v54 = vpop.f32.mrb[32].mxu0 }
 0x7e8   : > { %v4510_v55 = vpop.f32.mrb[37].mxu1  ;;  %v4518_v56 = vpop.f32.mrb[33].mxu0  ;;  %v2519_v42 = vadd.f32 %v4226_v40, %v5486_v53  ;;  %v2571_v51 = vadd.f32 %v4227_v48, %v5488_v54 }
 0x7e9   : > { %v2521_v57 = vpop.f32.mrb[38].mxu1  ;;  %v2573_v58 = vpop.f32.mrb[34].mxu0  ;;  %v4228_v56 = vld [vmem:[%s5825_s11 + $0x2] ss:$0 sm:$0xff] }
 0x7ea   : > { %v4511_v59 = vpop.f32.mrb[39].mxu1  ;;  %v4519_v60 = vpop.f32.mrb[35].mxu0  ;;  %v2867_v46 = vpack.c.bf16 %v2519_v42, %v2519_v42  ;;  %v2868_v53 = vpack.c.bf16 %v2571_v51, %v2571_v51 }
 0x7ef   : > { %v5490_v61 = vpop.f32.mrb[40].mxu1  ;;  %v5492_v62 = vpop.f32.mrb[36].mxu0 }
 0x7f0   : > { %v4526_v63 = vpop.f32.mrb[41].mxu1  ;;  %v4534_v0 = vpop.f32.mrb[37].mxu0  ;;  %v2623_v58 = vadd.f32 %v4228_v56, %v5490_v61  ;;  %v4253_v61 = vld [vmem:[%s5828_s17] ss:$0 sm:$0xff] }
 0x7f1   : > { %v2625_v1 = vpop.f32.mrb[42].mxu1  ;;  %v2677_v2 = vpop.f32.mrb[38].mxu0  ;;  %v4229_v63 = vld [vmem:[%s5825_s11 + $0x3] ss:$0 sm:$0xff] }
 0x7f2   : > { %v4527_v3 = vpop.f32.mrb[43].mxu1  ;;  %v4535_v4 = vpop.f32.mrb[39].mxu0  ;;  %v2869_v54 = vpack.c.bf16 %v2623_v58, %v2623_v58  ;;  %v2675_v0 = vadd.f32 %v4229_v63, %v5492_v62 }
 0x7f4   : > { %v2870_v1 = vpack.c.bf16 %v2675_v0, %v2675_v0 }
 0x7f7   : > { %v4542_v8 = vpop.f32.mrb[44].mxu1 }
 0x7f8   : > { %v2764_v9 = vpop.f32.mrb[45].mxu1  ;;  %v2773_v15 = vadd.f32 %v4542_v8, %v4242_v6 }
 0x7f9   : > { %v2765_v10 = vadd.f32 %v4242_v6, %v2764_v9  ;;  %v4543_v11 = vpop.f32.mrb[46].mxu1 }
 0x7fa   : > { %v2767_v12 = vpop.f32.mrb[47].mxu1  ;;  %v2776_v18 = vadd.f32 %v4543_v11, %v4242_v6 }
 0x7fb   : > { %2827 = vxpose.xlu1.b32.start [1/16] (narrow) %v2765_v10, 64  ;;  %v2768_v7 = vadd.f32 %v4242_v6, %v2767_v12 }
 0x7ff   : > { %2828 = vxpose.xlu1.b32.cont [2/16] (narrow) %v2768_v7, 64  ;;  %v4546_v13 = vpop.f32.mrb[48].mxu1 }
 0x800   : > { %v2780_v14 = vpop.f32.mrb[49].mxu1  ;;  %v2789_v28 = vadd.f32 %v4546_v13, %v4242_v6 }
 0x801   : > { %v4547_v16 = vpop.f32.mrb[50].mxu1  ;;  %v2781_v19 = vadd.f32 %v4242_v6, %v2780_v14 }
 0x802   : > { %v2783_v17 = vpop.f32.mrb[51].mxu1  ;;  %v2792_v31 = vadd.f32 %v4547_v16, %v4242_v6 }
 0x803   : > { %2829 = vxpose.xlu1.b32.cont [3/16] (narrow) %v2773_v15, 64  ;;  %v2784_v25 = vadd.f32 %v4242_v6, %v2783_v17 }
 0x807   : > { %2830 = vxpose.xlu1.b32.cont [4/16] (narrow) %v2776_v18, 64  ;;  %v4550_v20 = vpop.f32.mrb[52].mxu1 }
 0x808   : > { %v2796_v22 = vpop.f32.mrb[53].mxu1  ;;  %v2805_v34 = vadd.f32 %v4550_v20, %v4242_v6 }
 0x809   : > { %v4551_v23 = vpop.f32.mrb[54].mxu1  ;;  %v2797_v32 = vadd.f32 %v4242_v6, %v2796_v22 }
 0x80a   : > { %v2799_v24 = vpop.f32.mrb[55].mxu1  ;;  %v2808_v35 = vadd.f32 %v4551_v23, %v4242_v6 }
 0x80b   : > { %2831 = vxpose.xlu1.b32.cont [5/16] (narrow) %v2781_v19, 64  ;;  %v2800_v33 = vadd.f32 %v4242_v6, %v2799_v24 }
 0x80f   : > { %2832 = vxpose.xlu1.b32.cont [6/16] (narrow) %v2784_v25, 64  ;;  %v4554_v26 = vpop.f32.mrb[56].mxu1 }
 0x810   : > { %v2812_v27 = vpop.f32.mrb[57].mxu1  ;;  %v2821_v38 = vadd.f32 %v4554_v26, %v4242_v6 }
 0x811   : > { %v4555_v29 = vpop.f32.mrb[58].mxu1  ;;  %v2813_v36 = vadd.f32 %v4242_v6, %v2812_v27 }
 0x812   : > { %v2815_v30 = vpop.f32.mrb[59].mxu1  ;;  %v2824_v39 = vadd.f32 %v4555_v29, %v4242_v6 }
 0x813   : > { %2833 = vxpose.xlu1.b32.cont [7/16] (narrow) %v2789_v28, 64  ;;  %v2816_v37 = vadd.f32 %v4242_v6, %v2815_v30 }
 0x817   : > { %2834 = vxpose.xlu1.b32.cont [8/16] (narrow) %v2792_v31, 64 }
 0x81b   : > { %2835 = vxpose.xlu1.b32.cont [9/16] (narrow) %v2797_v32, 64 }
 0x81f   : > { %2836 = vxpose.xlu1.b32.cont [10/16] (narrow) %v2800_v33, 64 }
 0x823   : > { %2837 = vxpose.xlu1.b32.cont [11/16] (narrow) %v2805_v34, 64 }
 0x827   : > { %2838 = vxpose.xlu1.b32.cont [12/16] (narrow) %v2808_v35, 64 }
 0x82b   : > { %2839 = vxpose.xlu1.b32.cont [13/16] (narrow) %v2813_v36, 64 }
 0x82f   : > { %2840 = vxpose.xlu1.b32.cont [14/16] (narrow) %v2816_v37, 64 }
 0x833   : > { %2841 = vxpose.xlu1.b32.cont [15/16] (narrow) %v2821_v38, 64 }
 0x837   : > { %2842 = vxpose.xlu1.b32.end [16/16] (narrow) %v2824_v39, 64 }
 0x87b   : > { %v2843_v41 = vpop.trf.xlu1 }
 0x87c   : > { %v2859_v43 = vpack.c.bf16 %v2843_v41, %v2843_v41 }
 0x87e   : > { %v2881_v44 = vsel %vm1767_vm3, %v2859_v43, 0 }
 0x87f   : > { %4557 = vmatpush3.bf16.msra.mxu0 %v2881_v44  ;;  %v2844_v45 = vpop.trf.xlu1 }
 0x880   : > { %v2860_v47 = vpack.c.bf16 %v2844_v45, %v2844_v45  ;;  %4562 = vmatprep.subr.bf16.mxu0 %v4955_v5 }
 0x882   : > { %4559 = vmatmul.mubr.msk.bf16.vlgmr.msra.gmra.mrb[40].mxu0 %vm1763_vm4, %v2867_v46  ;;  %v2927_v49 = vsel %vm1767_vm3, %v2860_v47, 0 }
 0x883   : > { %4563 = vmatpush3.bf16.msra.mxu0 %v2927_v49  ;;  %4564 = vmatprep.mubr.msk.bf16.mxu0 %vm4956_vm1, %v4955_v5  ;;  %v2845_v50 = vpop.trf.xlu1 }
 0x884   : > { %v2861_v52 = vpack.c.bf16 %v2845_v50, %v2845_v50  ;;  %4568 = vmatprep.subr.bf16.mxu0 %v4955_v5 }
 0x886   : > { %v2973_v55 = vsel %vm1767_vm3, %v2861_v52, 0 }
 0x887   : > { %v2846_v57 = vpop.trf.xlu1 }
 0x888   : > { %v2862_v59 = vpack.c.bf16 %v2846_v57, %v2846_v57 }
 0x88a   : > { %4565 = vmatmul.mubr.msk.bf16.vlgmr.msra.gmra.mrb[44].mxu0 %vm1763_vm4, %v2868_v53  ;;  %v3019_v60 = vsel %vm1767_vm3, %v2862_v59, 0 }
 0x88b   : > { %4569 = vmatpush3.bf16.msra.mxu0 %v2973_v55  ;;  %4570 = vmatprep.mubr.msk.bf16.mxu0 %vm4956_vm1, %v4955_v5  ;;  %v2847_v38 = vpop.trf.xlu1 }
 0x88c   : > { %4574 = vmatprep.subr.bf16.mxu0 %v4955_v5  ;;  %v2863_v39 = vpack.c.bf16 %v2847_v38, %v2847_v38 }
 0x88e   : > { %4581 = vmatpush3.bf16.xpose.msra.mxu1 %v2863_v39 }
 0x88f   : > { %4592 = vmatprep.subr.bf16.mxu1 %v4955_v5  ;;  %v2848_v41 = vpop.trf.xlu1 }
 0x890   : > { %v2864_v42 = vpack.c.bf16 %v2848_v41, %v2848_v41 }
 0x892   : > { %4571 = vmatmul.mubr.msk.bf16.vlgmr.msra.gmra.mrb[48].mxu0 %vm1763_vm4, %v2869_v54 }
 0x893   : > { %4575 = vmatpush3.bf16.msra.mxu0 %v3019_v60  ;;  %4576 = vmatprep.mubr.msk.bf16.mxu0 %vm4956_vm1, %v4955_v5  ;;  %v2849_v45 = vpop.trf.xlu1 }
 0x894   : > { %4586 = vmatprep.subr.bf16.mxu0 %v4955_v5  ;;  %v2865_v48 = vpack.c.bf16 %v2849_v45, %v2849_v45 }
 0x897   : > { %v2850_v51 = vpop.trf.xlu1 }
 0x898   : > { %v2866_v55 = vpack.c.bf16 %v2850_v51, %v2850_v51 }
 0x89a   : > { %4577 = vmatmul.mubr.msk.bf16.vlgmr.msra.gmra.mrb[52].mxu0 %vm1763_vm4, %v2870_v1  ;;  %v2439_v1 = vld [vmem:[%s5250_s8] sm:$0xf] }
 0x89b   : > { %4588 = vmatprep.mubr.msk.bf16.mxu0 %vm4956_vm1, %v4955_v5 }
 0x89c   : > { %4587 = vmatpush3.bf16.xpose.msra.mxu0 %v2864_v42 }
 0x89d   : > { %4598 = vmatprep.subr.bf16.mxu0 %v4955_v5 }
 0x955   : > { %v2917_v2 = vpop.f32.mrb[40].mxu0 }
 0x956   : > { %v2918_v3 = vadd.f32 %v4253_v61, %v2917_v2  ;;  %v4560_v4 = vpop.f32.mrb[41].mxu0  ;;  %v2440_v2 = vld [vmem:[%s5250_s8 + $0x4] sm:$0xf] }
 0x957   : > { %v2920_v6 = vpop.f32.mrb[42].mxu0  ;;  %v2441_v4 = vld [vmem:[%s5250_s8 + $0x8] sm:$0xf] }
 0x958   : > { %3061 = vmax.xlane.f32.xlu0 %v2918_v3  ;;  %v4561_v8 = vpop.f32.mrb[43].mxu0 }
 0x95d   : > { %v2963_v9 = vpop.f32.mrb[44].mxu0 }
 0x95e   : > { %v2964_v10 = vadd.f32 %v4253_v61, %v2963_v9  ;;  %v4566_v11 = vpop.f32.mrb[45].mxu0 }
 0x95f   : > { %v2966_v62 = vpop.f32.mrb[46].mxu0 }
 0x960   : > { %3063 = vmax.xlane.f32.xlu0 %v2964_v10  ;;  %v4567_v12 = vpop.f32.mrb[47].mxu0 }
 0x961   : > { %v2442_v12 = vld [vmem:[%s5250_s8 + $0xc] sm:$0xf] }
 0x965   : > { %v3009_v7 = vpop.f32.mrb[48].mxu0 }
 0x966   : > { %v3010_v13 = vadd.f32 %v4253_v61, %v3009_v7  ;;  %v4572_v14 = vpop.f32.mrb[49].mxu0 }
 0x967   : > { %v3012_v15 = vpop.f32.mrb[50].mxu0 }
 0x968   : > { %3065 = vmax.xlane.f32.xlu0 %v3010_v13  ;;  %v4573_v16 = vpop.f32.mrb[51].mxu0  ;;  %v3407_v15 = vsel %vm1767_vm3, %v2442_v12, 0  ;;  %v4264_v12 = vld [vmem:[%s1353_s30] ss:$0 sm:$0xff] }
 0x96d   : > { %v3055_v17 = vpop.f32.mrb[52].mxu0 }
 0x96e   : > { %v3056_v18 = vadd.f32 %v4253_v61, %v3055_v17  ;;  %v4578_v19 = vpop.f32.mrb[53].mxu0  ;;  %v3269_v61 = vsel %vm1767_vm3, %v2439_v1, 0 }
 0x96f   : > { %v3058_v20 = vpop.f32.mrb[54].mxu0 }
 0x970   : > { %3067 = vmax.xlane.f32.xlu0 %v3056_v18  ;;  %v4579_v22 = vpop.f32.mrb[55].mxu0 }
 0x9e5   : > { %v3062_v23 = vpop.xlane.xlu0 %3061 }
 0x9e6   : > { %v3069_v24 = vsub.f32 %v2918_v3, %v3062_v23  ;;  %v3315_v3 = vsel %vm1767_vm3, %v2440_v2, 0  ;;  %v4783_v2 = vld [vmem:[%s5255_s14] sm:$0xff]  }
 0x9e8   : > { %v3073_v25 = vmul.f32 1.442695, %v3069_v24 }
 0x9ea   : > { %4807 = vpow2.f32 %v3073_v25 }
 0x9ed   : > { %v3064_v26 = vpop.xlane.xlu0 %3063 }
 0x9ee   : > { %v3070_v27 = vsub.f32 %v2964_v10, %v3064_v26  ;;  %v3361_v10 = vsel %vm1767_vm3, %v2441_v4, 0  ;;  %v4786_v4 = vld [vmem:[%s5261_s19 + $0x8] sm:$0xff]  }
 0x9f0   : > { %v3075_v28 = vmul.f32 1.442695, %v3070_v27 }
 0x9f2   : > { %4809 = vpow2.f32 %v3075_v28 }
 0x9f4   : > { %v4808_v29 = vpop.eup %4807 }
 0x9f5   : > { %v3066_v30 = vpop.xlane.xlu0 %3065  ;;  %3081 = vadd.xlane.f32.xlu0 %v4808_v29 }
 0x9f6   : > { %v3071_v31 = vsub.f32 %v3010_v13, %v3066_v30 }
 0x9f8   : > { %v3077_v32 = vmul.f32 1.442695, %v3071_v31 }
 0x9fa   : > { %4811 = vpow2.f32 %v3077_v32 }
 0x9fc   : > { %v4810_v33 = vpop.eup %4809 }
 0x9fd   : > { %3083 = vadd.xlane.f32.xlu0 %v4810_v33  ;;  %v3068_v34 = vpop.xlane.xlu0 %3067 }
 0x9fe   : > { %v3072_v35 = vsub.f32 %v3056_v18, %v3068_v34 }
 0xa00   : > { %v3079_v36 = vmul.f32 1.442695, %v3072_v35 }
 0xa02   : > { %4813 = vpow2.f32 %v3079_v36 }
 0xa04   : > { %v4812_v37 = vpop.eup %4811 }
 0xa05   : > { %3085 = vadd.xlane.f32.xlu0 %v4812_v37 }
 0xa0c   : > { %v4814_v40 = vpop.eup %4813 }
 0xa0d   : > { %3087 = vadd.xlane.f32.xlu0 %v4814_v40 }
 0xa82   : > { %v3082_v43 = vpop.xlane.xlu0 %3081 }
 0xa83   : > { %4815 = vrcp.f32 %v3082_v43 }
 0xa8a   : > { %v3084_v44 = vpop.xlane.xlu0 %3083 }
 0xa8b   : > { %4817 = vrcp.f32 %v3084_v44 }
 0xa8d   : > { %v4816_v46 = vpop.eup %4815 }
 0xa8e   : > { %v5530_v47 = vmul.f32 %v4816_v46, %v4808_v29 }
 0xa90   : > { %v3097_v49 = vpack.c.bf16 %v5530_v47, %v5530_v47 }
 0xa92   : > { %v3086_v50 = vpop.xlane.xlu0 %3085  ;;  %4583 = vmatmul.mubr.bf16.vlgmr.msra.gmra.mrb[60].mxu1 %v3097_v49 }
 0xa93   : > { %4819 = vrcp.f32 %v3086_v50  ;;  %4593 = vmatpush3.bf16.xpose.msra.mxu1 %v2865_v48  ;;  %4594 = vmatprep.mubr.msk.bf16.mxu1 %vm4956_vm1, %v4955_v5  ;;  %v4262_v48 = vld [vmem:[%s1325_s26] ss:$0 sm:$0xff] }
 0xa94   : > { %4604 = vmatprep.subr.bf16.mxu1 %v4955_v5 }
 0xa95   : > { %v4818_v52 = vpop.eup %4817 }
 0xa96   : > { %v5537_v53 = vmul.f32 %v4818_v52, %v4810_v33 }
 0xa98   : > { %v3098_v56 = vpack.c.bf16 %v5537_v53, %v5537_v53 }
 0xa9a   : > { %v3088_v57 = vpop.xlane.xlu0 %3087  ;;  %4589 = vmatmul.mubr.bf16.vlgmr.msra.gmra.mrb[56].mxu0 %v3098_v56 }
 0xa9b   : > { %4821 = vrcp.f32 %v3088_v57  ;;  %4599 = vmatpush3.bf16.xpose.msra.mxu0 %v2866_v55  ;;  %4600 = vmatprep.mubr.msk.bf16.mxu0 %vm4956_vm1, %v4955_v5 }
 0xa9c   : > { %4610 = vmatprep.subr.bf16.mxu0 %v4955_v5 }
 0xa9d   : > { %v4820_v58 = vpop.eup %4819 }
 0xa9e   : > { %v5544_v59 = vmul.f32 %v4820_v58, %v4812_v37 }
 0xaa0   : > { %v3099_v54 = vpack.c.bf16 %v5544_v59, %v5544_v59 }
 0xaa2   : > { %4595 = vmatmul.mubr.bf16.vlgmr.msra.gmra.mrb[64].mxu1 %v3099_v54 }
 0xaa3   : > { %4606 = vmatprep.mubr.msk.bf16.mxu1 %vm4956_vm1, %v4955_v5  ;;  %4605 = vmatpush3.bf16.msra.mxu1 %v3269_v61 }
 0xaa4   : > { %4616 = vmatprep.subr.bf16.mxu1 %v4955_v5 }
 0xaa5   : > { %v4822_v60 = vpop.eup %4821 }
 0xaa6   : > { %v5550_v63 = vmul.f32 %v4822_v60, %v4814_v40 }
 0xaa8   : > { %v3100_v0 = vpack.c.bf16 %v5550_v63, %v5550_v63 }
 0xaaa   : > { %4601 = vmatmul.mubr.bf16.vlgmr.msra.gmra.mrb[60].mxu0 %v3100_v0 }
 0xaab   : > { %4612 = vmatprep.mubr.msk.bf16.mxu0 %vm4956_vm1, %v4955_v5  ;;  %4611 = vmatpush3.bf16.msra.mxu0 %v3315_v3  ;;  %v4784_v3 = vld [vmem:[%s5255_s14 + $0x8] sm:$0xff]  }
 0xaac   : > { %4622 = vmatprep.subr.bf16.mxu0 %v4955_v5 }
 0xb65   : > { %v3135_v6 = vpop.f32.mrb[60].mxu1 }
 0xb66   : > { %v3261_v8 = vpack.c.bf16 %v3135_v6, %v3135_v6  ;;  %v4584_v9 = vpop.f32.mrb[61].mxu1 }
 0xb67   : > { %v3138_v11 = vpop.f32.mrb[62].mxu1 }
 0xb68   : > { %v4585_v62 = vpop.f32.mrb[63].mxu1  ;;  %4607 = vmatmul.mubr.msk.bf16.vlgmr.msra.gmra.mrb[68].mxu1 %vm1763_vm4, %v3261_v8  ;;  %v4263_v11 = vld [vmem:[%s1350_s2] ss:$0 sm:$0xff] }
 0xb69   : > { %4617 = vmatpush3.bf16.msra.mxu1 %v3361_v10  ;;  %4618 = vmatprep.mubr.msk.bf16.mxu1 %vm4956_vm1, %v4955_v5 }
 0xb6a   : > { %4628 = vmatprep.subr.bf16.mxu1 %v4955_v5 }
 0xb6d   : > { %v3175_v7 = vpop.f32.mrb[56].mxu0 }
 0xb6e   : > { %v3262_v13 = vpack.c.bf16 %v3175_v7, %v3175_v7  ;;  %v4590_v14 = vpop.f32.mrb[57].mxu0 }
 0xb6f   : > { %v3178_v16 = vpop.f32.mrb[58].mxu0 }
 0xb70   : > { %v4591_v17 = vpop.f32.mrb[59].mxu0  ;;  %4613 = vmatmul.mubr.msk.bf16.vlgmr.msra.gmra.mrb[64].mxu0 %vm1763_vm4, %v3262_v13  ;;  %v4788_v16 = vld [vmem:[%s5261_s19 + $0x18] sm:$0xff]  }
 0xb71   : > { %4623 = vmatpush3.bf16.msra.mxu0 %v3407_v15  ;;  %4624 = vmatprep.mubr.msk.bf16.mxu0 %vm4956_vm1, %v4955_v5  ;;  %v4787_v15 = vld [vmem:[%s5261_s19 + $0x10] sm:$0xff]   ;;  %v4265_v17 = vld [vmem:[%s1333_s28] ss:$0 sm:$0xff]  ;;  %s5836_s28 = sld [smem:[#allocation39_spill]] }
 0xb72   : > { %4636 = vmatprep.subr.bf16.mxu0 %v4955_v5 }
 0xb75   : > { %v3215_v18 = vpop.f32.mrb[64].mxu1 }
 0xb76   : > { %v3263_v19 = vpack.c.bf16 %v3215_v18, %v3215_v18  ;;  %v4596_v20 = vpop.f32.mrb[65].mxu1 }
 0xb77   : > { %v3218_v22 = vpop.f32.mrb[66].mxu1  ;;  %p4277_p2 = scmp.ne.s32.totalorder %s5836_s28, 1 }
 0xb78   : > { %v4597_v23 = vpop.f32.mrb[67].mxu1  ;;  %4619 = vmatmul.mubr.msk.bf16.vlgmr.msra.gmra.mrb[72].mxu1 %vm1763_vm4, %v3263_v19  ;;  %s5838_s2 = sld [smem:[#allocation33_spill]] (!%p4277_p2)  ;;  %3748 = vst [vmem:[%s5278_s0] sm:$0xff] (!%p4277_p2), %v5530_v47  ;;  %3749 = vst [vmem:[%s5278_s0 + $0x8] sm:$0xff] (!%p4277_p2), %v5537_v53  ;;  %vm4958_vm6 = vmmov (!%p4277_p2), 0  }
 0xb79   : > { %4632 = vmatprep.mubr.msk.bf16.mxu1 %vm4956_vm1, %v4955_v5  ;;  %4629 = vmatpush3.bf16.msra.mxu1 %v4783_v2  ;;  %3750 = vst [vmem:[%s5278_s0 + $0x10] sm:$0xff] (!%p4277_p2), %v5544_v59  ;;  %3751 = vst [vmem:[%s5278_s0 + $0x18] sm:$0xff] (!%p4277_p2), %v5550_v63 }
 0xb7a   : > { %4630 = vmatprep.subr.bf16.mxu1 %v4955_v5 }
 0xb7d   : > { %v3255_v24 = vpop.f32.mrb[60].mxu0  ;;  %4631 = vmatpush3.bf16.msra.mxu1 %v4784_v3 }
 0xb7e   : > { %v3264_v25 = vpack.c.bf16 %v3255_v24, %v3255_v24  ;;  %v4602_v26 = vpop.f32.mrb[61].mxu0  ;;  %v4278_v47 = vld [vmem:[%s5838_s2] ss:$0 sm:$0xff] (!%p4277_p2) }
 0xb7f   : > { %v3258_v27 = vpop.f32.mrb[62].mxu0  ;;  %v4269_v26 = vld [vmem:[%s1341_s9] ss:$0 sm:$0xff]  ;;  %s5837_s9 = sld [smem:[#allocation32_spill]] (!%p4277_p2) }
 0xb80   : > { %v4603_v28 = vpop.f32.mrb[63].mxu0  ;;  %4625 = vmatmul.mubr.msk.bf16.vlgmr.msra.gmra.mrb[68].mxu0 %vm1763_vm4, %v3264_v25 }
 0xb81   : > { %4644 = vmatprep.mubr.msk.bf16.mxu0 %vm4956_vm1, %v4955_v5 }
 0xc3b   : > { %v3305_v29 = vpop.f32.mrb[68].mxu1 }
 0xc3c   : > { %v4608_v30 = vpop.f32.mrb[69].mxu1  ;;  %v3449_v34 = vsel %vm1461_vm2, %v3305_v29, 0.0 }
 0xc3d   : > { %v3308_v31 = vpop.f32.mrb[70].mxu1 }
 0xc3e   : > { %v4609_v32 = vpop.f32.mrb[71].mxu1 }
 0xc43   : > { %v3351_v33 = vpop.f32.mrb[64].mxu0 }
 0xc44   : > { %v3450_v35 = vsel %vm1461_vm2, %v3351_v33, 0.0  ;;  %v4614_v36 = vpop.f32.mrb[65].mxu0 }
 0xc45   : > { %v3451_v37 = vadd.f32 %v3450_v35, %v3449_v34  ;;  %v3354_v38 = vpop.f32.mrb[66].mxu0 }
 0xc46   : > { %v4615_v39 = vpop.f32.mrb[67].mxu0 }
 0xc4b   : > { %v3397_v40 = vpop.f32.mrb[72].mxu1 }
 0xc4c   : > { %v3452_v41 = vsel %vm1461_vm2, %v3397_v40, 0.0  ;;  %v4620_v42 = vpop.f32.mrb[73].mxu1 }
 0xc4d   : > { %v3453_v43 = vadd.f32 %v3452_v41, %v3451_v37  ;;  %v3400_v44 = vpop.f32.mrb[74].mxu1  ;;  %v4275_v42 = vld [vmem:[%s1356_s22] ss:$0 sm:$0xff]  ;;  %s5840_s22 = sld [smem:[#allocation50_spill]] (!%p4277_p2) }
 0xc4e   : > { %v4621_v45 = vpop.f32.mrb[75].mxu1  ;;  %v4276_v44 = vld [vmem:[%s1359_s6] ss:$0 sm:$0xff]  ;;  %s5839_s6 = sld [smem:[#allocation34_spill]] (!%p4277_p2) }
 0xc53   : > { %v3443_v46 = vpop.f32.mrb[68].mxu0 }
 0xc54   : > { %v3454_v49 = vsel %vm1461_vm2, %v3443_v46, 0.0  ;;  %v4626_v50 = vpop.f32.mrb[69].mxu0  ;;  %s5841_s23 = scalar_lea.vmem (!%p4277_p2), %s5839_s6, %s5840_s22 }
 0xc55   : > { %v3455_v51 = vadd.f32 %v3454_v49, %v3453_v43  ;;  %v3446_v52 = vpop.f32.mrb[70].mxu0  ;;  %v4957_v49 = vmov (!%p4277_p2), 0.0   ;;  %v4828_v50 = vld [vmem:[%s5837_s9 + $0x8] sm:$0xff] (!%p4277_p2)  }
 0xc56   : > { %v4627_v55 = vpop.f32.mrb[71].mxu0 }
 0xc57   : > { %v3462_v56 = vadd.f32 %v4262_v48, %v3455_v51  ;;  %v4827_v48 = vld [vmem:[%s5837_s9] sm:$0xff] (!%p4277_p2)  }
 0xc59   : > { %v3463_v57 = vadd.f32 %v3462_v56, %v5436_v21  ;;  %v4785_v21 = vld [vmem:[%s5261_s19] sm:$0xff]  }
 0xc5a   : > { %4637 = vmatpush3.bf16.msra.mxu0 %v4785_v21 }
 0xc5b   : > { %v3466_v58 = vsel %vm1461_vm2, %v3463_v57, 0.0  ;;  %4638 = vmatprep.subr.bf16.mxu0 %v4955_v5 }
 0xc5c   : > { %3467 = vadd.xlane.f32.xlu0 %v3466_v58 }
 0xc5e   : > { %4639 = vmatpush3.bf16.msra.mxu0 %v4786_v4 }
 0xc5f   : > { %4640 = vmatprep.subr.bf16.mxu0 %v4955_v5 }
 0xc62   : > { %4641 = vmatpush3.bf16.msra.mxu0 %v4787_v15 }
 0xc63   : > { %4642 = vmatprep.subr.bf16.mxu0 %v4955_v5 }
 0xc66   : > { %4643 = vmatpush3.bf16.msra.mxu0 %v4788_v16 }
 0xc67   : > { %4648 = vmatprep.subr.bf16.mxu0 (!%p4277_p2), %v4957_v49 }
 0xce9   : > { %v3468_v54 = vpop.xlane.xlu0 %3467 }
 0xcea   : > { %v3469_v60 = vmul.f32 0.03125, %v3468_v54 }
 0xcec   : > { %v3470_v0 = vsub.f32 %v3463_v57, %v3469_v60 }
 0xcee   : > { %v3471_v1 = vmul.f32 %v3470_v0, %v3470_v0 }
 0xcf0   : > { %v3472_v61 = vsel %vm1461_vm2, %v3471_v1, 0.0 }
 0xcf1   : > { %3473 = vadd.xlane.f32.xlu0 %v3472_v61 }
 0xd7e   : > { %v3474_v6 = vpop.xlane.xlu0 %3473 }
 0xd7f   : > { %v3475_v8 = vmul.f32 0.03125, %v3474_v6 }
 0xd81   : > { %v3476_v9 = vadd.f32 1e-05, %v3475_v8 }
 0xd83   : > { %4823 = vrsqrt.f32 %v3476_v9 }
 0xd8d   : > { %v4824_v10 = vpop.eup %4823 }
 0xd8e   : > { %v3478_v62 = vmul.f32 %v4824_v10, %v3470_v0 }
 0xd90   : > { %v3485_v7 = vmul.f32 %v4263_v11, %v3478_v62 }
 0xd92   : > { %v3492_v13 = vadd.f32 %v4264_v12, %v3485_v7 }
 0xd94   : > { %v3493_v14 = vpack.c.bf16 %v3492_v13, %v3492_v13 }
 0xd96   : > { %4633 = vmatmul.mubr.msk.bf16.vlgmr.msra.gmra.mrb[76].mxu1 %vm1461_vm2, %v3493_v14 }
 0xe69   : > { %v3554_v18 = vpop.f32.mrb[76].mxu1 }
 0xe6a   : > { %v3555_v19 = vadd.f32 %v4265_v17, %v3554_v18  ;;  %v4634_v20 = vpop.f32.mrb[77].mxu1 }
 0xe6b   : > { %v3557_v22 = vpop.f32.mrb[78].mxu1 }
 0xe6c   : > { %v3560_v23 = vmax.f32 %v3555_v19, 0.0  ;;  %v4635_v24 = vpop.f32.mrb[79].mxu1 }
 0xe6e   : > { %v3561_v25 = vpack.c.bf16 %v3560_v23, %v3560_v23 }
 0xe70   : > { %4645 = vmatmul.mubr.msk.bf16.vlgmr.msra.gmra.mrb[72].mxu0 %vm3601_vm5, %v3561_v25 }
 0xe71   : > { %4649 = vmatpush3.bf16.msra.mxu0 (!%p4277_p2), %v4827_v48  ;;  %4652 = vmatprep.mubr.msk.bf16.mxu0 (!%p4277_p2), %vm4958_vm6, %v4957_v49 }
 0xe72   : > { %4650 = vmatprep.subr.bf16.mxu0 (!%p4277_p2), %v4957_v49 }
 0xe75   : > { %4651 = vmatpush3.bf16.msra.mxu0 (!%p4277_p2), %v4828_v50 }
 0xf43   : > { %v3639_v27 = vpop.f32.mrb[72].mxu0 }
 0xf44   : > { %v3640_v28 = vadd.f32 %v4269_v26, %v3639_v27  ;;  %v4646_v29 = vpop.f32.mrb[73].mxu0 }
 0xf45   : > { %v3642_v30 = vpop.f32.mrb[74].mxu0 }
 0xf46   : > { %v4647_v5 = vpop.f32.mrb[75].mxu0  ;;  %v3645_v31 = vadd.f32 %v3640_v28, %v3492_v13 }
 0xf48   : > { %v3648_v32 = vsel %vm1461_vm2, %v3645_v31, 0.0 }
 0xf49   : > { %3649 = vadd.xlane.f32.xlu0 %v3648_v32 }
 0xfd6   : > { %v3650_v33 = vpop.xlane.xlu0 %3649 }
 0xfd7   : > { %v3651_v34 = vmul.f32 0.03125, %v3650_v33 }
 0xfd9   : > { %v3652_v35 = vsub.f32 %v3645_v31, %v3651_v34 }
 0xfdb   : > { %v3653_v36 = vmul.f32 %v3652_v35, %v3652_v35 }
 0xfdd   : > { %v3654_v37 = vsel %vm1461_vm2, %v3653_v36, 0.0 }
 0xfde   : > { %3655 = vadd.xlane.f32.xlu0 %v3654_v37 }
0x106b   : > { %v3656_v38 = vpop.xlane.xlu0 %3655 }
0x106c   : > { %v3657_v39 = vmul.f32 0.03125, %v3656_v38 }
0x106e   : > { %v3658_v40 = vadd.f32 1e-05, %v3657_v39 }
0x1070   : > { %4825 = vrsqrt.f32 %v3658_v40 }
0x107a   : > { %v4826_v41 = vpop.eup %4825 }
0x107b   : > { %v3660_v43 = vmul.f32 %v4826_v41, %v3652_v35  ;;  %3679 = sbr.rel (%p4277_p2) target bundleno = 4442 (0x115a), region = 144 }
0x107d   : > { %v3667_v45 = vmul.f32 %v4275_v42, %v3660_v43 }
0x107f   : > { %v3674_v46 = vadd.f32 %v4276_v44, %v3667_v45 }
0x1081   : > { %3675 = vst.msk [vmem:[#allocation2] sm:$0xff] %vm1461_vm2, %v3674_v46  ;;  %v3680_v51 = vpack.c.bf16 (!%p4277_p2), %v3674_v46, %v3674_v46 }
0x1083   : > { %4653 = vmatmul.mubr.msk.bf16.vlgmr.msra.gmra.mrb[0].mxu0 %vm1461_vm2, %v3680_v51 }
0x1156   : > { %v3741_v52 = vpop.f32.mrb[0].mxu0 }
0x1157   : > { %v3742_v53 = vadd.f32 %v4278_v47, %v3741_v52  ;;  %v4654_v55 = vpop.f32.mrb[1].mxu0 }
0x1158   : > { %v3744_v59 = vpop.f32.mrb[2].mxu0 }
0x1159   : > { %3747 = vst [vmem:[%s5841_s23] sm:$0xff] %v3742_v53  ;;  %v4655_v63 = vpop.f32.mrb[3].mxu0 }
0x115a PF: > { %s5842_s29 = sld [smem:[#allocation40_spill]]  ;;  %s5843_s3 = sld [smem:[#allocation35_spill]] }
0x115b   : > { %s5844_s20 = sld [smem:[#allocation37_spill]]  ;;  %s3773_s18 = sshll.u32 %s5278_s0, 4  ;;  %s5643_s18 = int_to_ptr.vmem [resolvable:$true] %s3773_s18 }
0x115c   : > { %s4829_s27 = scalar_lea.vmem %s5643_s18, 512  ;;  %s4959_s7 = smov [#allocation3]  }
0x115d   : > { %p4830_p4 = scmp.ne.s32.totalorder %s5643_s18, %s4829_s27  ;;  %s4833_s24 = sshll.u32 %s4959_s7, 4  ;;  %s4834_s24 = int_to_ptr.vmem [resolvable:$false] %s4833_s24 }
0x115e   : > { %s4835_s11 = scalar_lea.vmem %s4834_s24, 1024  ;;  %p4836_p7 = scmp.lt.s32.totalorder %s5643_s18, %s4834_s24 }
0x115f   : > { %p4831_p5 = pnand %p4830_p4, %p5171_p3  ;;  %p4837_p8 = scmp.lt.s32.totalorder %s4835_s11, %s4829_s27 }
0x1160   : > { %s4295_s15 = sshll.u32 %s5842_s29, 9 }
0x1161   : > { %s5640_s10 = scalar_lea.hbm %s5843_s3, %s4295_s15  ;;  %s5846_s1 = sand.u32 1, %s5844_s20  }
0x1162   : > { %s5647_s16 = scalar_lea.sflag [#allocation4], %s5846_s1  ;;  %p4832_p6 = pneg %p4831_p5 }
0x1163   : > { %p4838_p10 = por %p4837_p8, %p4836_p7 }
0x1165   : > { %p4839_p11 = pnand %p4838_p10, %p4832_p6 }
0x1167   : > { %4842 = shalt.err (!%p4839_p11)
}
0x1168   : > { %s4843_s0 = scalar_lea.hbm %s5640_s10, 512  ;;  %s4847_s13 = scalar_lea.hbm %s5843_s3, 1024 }
0x1169   : > { %p4844_p12 = scmp.ne.s32.totalorder %s5640_s10, %s4843_s0  ;;  %p4848_p1 = scmp.lt.u32.totalorder %s5640_s10, %s5843_s3 }
0x116a   : > { %p4849_p2 = scmp.lt.u32.totalorder %s4847_s13, %s4843_s0  ;;  %p4851_p5 = scmp.lt.u32.totalorder %s4843_s0, %s5640_s10 }
0x116b   : > { %p4845_p13 = pnand %p4844_p12, %p5171_p3 }
0x116c   : > { %p4850_p4 = por %p4849_p2, %p4848_p1 }
0x116d   : > { %p4846_p0 = pneg %p4845_p13 }
0x116e   : > { %p4852_p7 = por %p4851_p5, %p4850_p4 }
0x1170   : > { %p4853_p6 = pnand %p4852_p7, %p4846_p0 }
0x1172   : > { %4856 = shalt.err (!%p4853_p6)
}
0x1173   : > { %s4960_s5 = smov 128   ;;  %s4961_s17 = smov 8  }
0x1174   : > { %4656 = dma.vmem_to_hbm [thread:$0]  (%p5171_p3), %s5643_s18, 512, %s5640_s10, %s5647_s16, %s4960_s5, %s4960_s5, %s4961_s17  }
0x1175 PF: > { %s5847_s8 = sld [smem:[#allocation43_spill]]  ;;  %s5848_s26 = sld [smem:[#allocation36_spill]] }
0x117b   : > { %p4662_p8 = scmp.ge.s32.totalorder %s5847_s8, 2  ;;  %s3795_s25 = sand.u32 1, %s5848_s26  }
0x117c   : > { %s3796_s14 = scalar_lea.sflag [#allocation4], %s3795_s25 }
0x117d   : > { %p4659_p10 = pnand %p4662_p8, %p5181_p9 }
0x117f   : > { %4890 = dma.done.wait (!%p4659_p10), %s3796_s14, 512  }
0x1180   : > { %4892 = vsyncadd (!%p4659_p10), %s3796_s14, 4294966784  ;;  %s75_s1 = sadd.s32 1, %s5847_s8   ;;  %s5850_s15 = sld [smem:[#allocation37_spill]] }
0x1181   : > { %p72_p11 = scmp.ge.s32.totalorder %s75_s1, 6   ;;  %s5851_s16 = sld [smem:[#allocation38_spill]] }
0x1182   : > { %s5852_s18 = sld [smem:[#allocation48_spill]]  ;;  %s5853_s22 = sld [smem:[#allocation41_spill]] }
0x1183   : > { %s5854_s23 = sld [smem:[#allocation42_spill]]  ;;  %s5855_s26 = sld [smem:[#allocation44_spill]] }
0x1184   : > { %s5856_s28 = sld [smem:[#allocation46_spill]]  ;;  %74 = sbr.rel (!%p72_p11) target bundleno = 72 (0x48), region = 296 }
0x118b   :  { %3801 = vsyncpa [#allocation4], 1 }
0x118c   :  { %3803 = vsyncpa [#allocation4 + $0x1], 1 }

</bundles_post_ra>
